<compile_context>
chip_gen: v6e
topology: v6e:2x2x1
jax: 0.10.0
libtpu: 0.0.40
codegen_flags: <defaults>
</compile_context>

<pallas_src>
import jax
import jax.numpy as jnp
from jax import lax
from jax.experimental import pallas as pl
from jax.experimental.pallas import tpu as pltpu


# ------------------------- fused bidirectional LSTM recurrence -------------------------
def _make_bilstm_kernel(pool_only):
    def kernel(gxf_ref, gxb_ref, whhf_ref, whhb_ref, of_ref, ob_ref,
               hf, cf, hb, cb):
        s = pl.program_id(0)
        TB = gxf_ref.shape[0]
        H = hf.shape[-1]

        @pl.when(s == 0)
        def _():
            hf[...] = jnp.zeros_like(hf)
            cf[...] = jnp.zeros_like(cf)
            hb[...] = jnp.zeros_like(hb)
            cb[...] = jnp.zeros_like(cb)

        def cell(gx, h_ref, c_ref, whh_ref):
            # gx already holds x_t @ W_ih + (b_ih + b_hh) in f32; only the recurrent
            # matmul runs per step.  h is kept f32 and cast to bf16 for the MXU.
            gates = gx + jnp.dot(h_ref[...].astype(whh_ref.dtype), whh_ref[...],
                                 preferred_element_type=jnp.float32)   # (N, 4H)
            i_g = jax.nn.sigmoid(gates[:, 0 * H:1 * H])                # PyTorch order i,f,g,o
            f_g = jax.nn.sigmoid(gates[:, 1 * H:2 * H])
            g_g = jnp.tanh(gates[:, 2 * H:3 * H])
            o_g = jax.nn.sigmoid(gates[:, 3 * H:4 * H])
            c_new = f_g * c_ref[...] + i_g * g_g
            h_new = o_g * jnp.tanh(c_new)
            c_ref[...] = c_new
            h_ref[...] = h_new
            return h_new

        def body(j, carry):
            jb = TB - 1 - j
            # fwd processes global time s*TB + j; bwd processes T-1-(s*TB+j), which is
            # local index jb of the reversed-index-mapped bwd blocks.
            h_f = cell(gxf_ref[j].astype(jnp.float32), hf, cf, whhf_ref)
            h_b = cell(gxb_ref[jb].astype(jnp.float32), hb, cb, whhb_ref)
            if pool_only:
                # last layer: fuse MaxPool1d over the seq axis (N) into the epilogue
                of_ref[j] = jnp.max(h_f, axis=0, keepdims=True).astype(of_ref.dtype)
                ob_ref[jb] = jnp.max(h_b, axis=0, keepdims=True).astype(ob_ref.dtype)
            else:
                of_ref[j] = h_f.astype(of_ref.dtype)
                ob_ref[jb] = h_b.astype(ob_ref.dtype)
            return carry

        lax.fori_loop(0, TB, body, 0, unroll=True)

    return kernel


def _pick_tb(T, target=8):
    """Largest divisor of T that is <= target (timesteps per grid step)."""
    tb = min(T, target)
    while T % tb:
        tb -= 1
    return tb


def bilstm_layer(gx_f, gx_b, whh_f, whh_b, *, pool_only=False, out_dtype=jnp.bfloat16):
    """gx_{f,b}: (T, N, 4H) f32 pre-computed input gates; whh_{f,b}: (H, 4H).
    Returns (out_fwd, out_bwd): (T, N, H) if not pool_only, else (T, 1, H) pooled-over-N."""
    T, N, G = gx_f.shape
    H = whh_f.shape[0]
    TB = _pick_tb(T)
    nb = T // TB

    in_specs = [
        pl.BlockSpec((TB, N, G), lambda s: (s, 0, 0)),
        pl.BlockSpec((TB, N, G), lambda s: (nb - 1 - s, 0, 0)),   # reversed time for bwd
        # Constant-index weight specs stay resident in VMEM (could be pl.Buffered(1)
        # on VMEM-tight v7x configs; default buffering kept for portability).
        pl.BlockSpec((H, G), lambda s: (0, 0)),
        pl.BlockSpec((H, G), lambda s: (0, 0)),
    ]
    if pool_only:
        out_shape = (jax.ShapeDtypeStruct((T, 1, H), jnp.float32),
                     jax.ShapeDtypeStruct((T, 1, H), jnp.float32))
        out_specs = [pl.BlockSpec((TB, 1, H), lambda s: (s, 0, 0)),
                     pl.BlockSpec((TB, 1, H), lambda s: (nb - 1 - s, 0, 0))]
    else:
        out_shape = (jax.ShapeDtypeStruct((T, N, H), out_dtype),
                     jax.ShapeDtypeStruct((T, N, H), out_dtype))
        out_specs = [pl.BlockSpec((TB, N, H), lambda s: (s, 0, 0)),
                     pl.BlockSpec((TB, N, H), lambda s: (nb - 1 - s, 0, 0))]

    return pl.pallas_call(
        _make_bilstm_kernel(pool_only),
        out_shape=out_shape,
        grid_spec=pltpu.PrefetchScalarGridSpec(
            num_scalar_prefetch=0,
            grid=(nb,),
            in_specs=in_specs,
            out_specs=out_specs,
            scratch_shapes=[pltpu.VMEM((N, H), jnp.float32)] * 4,   # h_f, c_f, h_b, c_b
        ),
        compiler_params=pltpu.CompilerParams(
            dimension_semantics=("arbitrary",),          # true recurrence over T
            vmem_limit_bytes=32 * 1024 * 1024,
        ),
    )(gx_f, gx_b, whh_f, whh_b)


# ----------------------------- hoisted input projection (XLA) -----------------------------
def _input_gates(x_parts, w_ih, b):
    """sum_i x_i @ W_ih[rows_i] + (b_ih + b_hh), over the time-flattened input.
    The feature-concat of x_parts forms the layer input; the split matmul avoids an
    explicit jnp.concatenate of the previous layer's fwd/bwd halves."""
    T, N = x_parts[0].shape[:2]
    G = w_ih.shape[-1]
    acc = jnp.zeros((T * N, G), jnp.float32)
    row = 0
    for xp in x_parts:
        d = xp.shape[-1]
        acc = acc + jnp.dot(xp.reshape(T * N, d), w_ih[row:row + d],
                            preferred_element_type=jnp.float32)
        row += d
    return (acc + b).reshape(T, N, G)


# -------------------------------- head: fc + softmax kernel --------------------------------
def _head_kernel(pf_ref, pb_ref, pe_ref, wf_ref, wb_ref, we_ref, b_ref, probs_ref):
    # fc on the pooled concatenated features [lstm_fwd, lstm_bwd, embed], split matmul
    logits = (jnp.dot(pf_ref[...], wf_ref[...], preferred_element_type=jnp.float32)
              + jnp.dot(pb_ref[...], wb_ref[...], preferred_element_type=jnp.float32)
              + jnp.dot(pe_ref[...], we_ref[...], preferred_element_type=jnp.float32)
              + b_ref[...])                                        # (B, C)
    m = jnp.max(logits, axis=-1, keepdims=True)
    e = jnp.exp(logits - m)
    probs_ref[...] = e / jnp.sum(e, axis=-1, keepdims=True)        # softmax(dim=1)


def head(pooled_fwd, pooled_bwd, pooled_emb, w_fwd, w_bwd, w_emb, b_fc):
    B = pooled_fwd.shape[0]
    C = w_fwd.shape[-1]
    vmem = lambda: pl.BlockSpec(memory_space=pltpu.MemorySpace.VMEM)
    return pl.pallas_call(
        _head_kernel,
        out_shape=jax.ShapeDtypeStruct((B, C), jnp.float32),
        in_specs=[vmem() for _ in range(7)],       # all inputs are tiny pooled tensors
        out_specs=vmem(),
        compiler_params=pltpu.CompilerParams(vmem_limit_bytes=32 * 1024 * 1024),
    )(pooled_fwd, pooled_bwd, pooled_emb, w_fwd, w_bwd, w_emb, b_fc)


# --------------------------------------- full model ---------------------------------------
def rnn_forward(token_ids, params):
    # Embedding lookup (HBM gather) is glue, stays in plain JAX.
    emb = params["embedding"][token_ids]                  # (B, L, E) == (T, N, E), bf16
    n_layers = len(params["lstm"])
    x_parts = [emb]
    pooled_f = pooled_b = None
    for li, layer in enumerate(params["lstm"]):
        gx_f = _input_gates(x_parts, layer["fwd"]["w_ih"], layer["fwd"]["b"])
        gx_b = _input_gates(x_parts, layer["bwd"]["w_ih"], layer["bwd"]["b"])
        last = (li == n_layers - 1)
        out_f, out_b = bilstm_layer(gx_f, gx_b,
                                    layer["fwd"]["w_hh"], layer["bwd"]["w_hh"],
                                    pool_only=last)
        if last:
            pooled_f = out_f[:, 0, :]                     # (B, H) f32, pooled over seq
            pooled_b = out_b[:, 0, :]
        else:
            x_parts = [out_f, out_b]                      # "concat" kept split for next layer
    pooled_emb = jnp.max(emb, axis=1).astype(jnp.float32)  # (B, E), pooled once in wrapper
    return head(pooled_f, pooled_b, pooled_emb,
                params["w_fwd"], params["w_bwd"], params["w_emb"], params["b_fc"])


def init_params(key, n_vocab, embed_size, hidden_size, layer_num, num_classes,
                w_dtype=jnp.bfloat16):
    H = hidden_size
    keys = jax.random.split(key, 3 + 8 * layer_num)
    k = iter(keys)

    def u(kk, shape, scale, dtype=jnp.float32):
        return jax.random.uniform(kk, shape, jnp.float32, -scale, scale).astype(dtype)

    params = {"embedding": jax.random.normal(next(k), (n_vocab, embed_size),
                                             jnp.float32).astype(w_dtype)}
    scale = 1.0 / float(H) ** 0.5
    layers = []
    for l in range(layer_num):
        in_dim = embed_size if l == 0 else 2 * H
        layer = {}
        for d in ("fwd", "bwd"):
            w_ih = u(next(k), (in_dim, 4 * H), scale, w_dtype)       # == torch W_ih.T
            w_hh = u(next(k), (H, 4 * H), scale, w_dtype)            # == torch W_hh.T
            # combined bias: two independent U(-s, s) draws summed (== b_ih + b_hh)
            b = u(next(k), (1, 4 * H), scale) + u(next(k), (1, 4 * H), scale)
            layer[d] = {"w_ih": w_ih, "w_hh": w_hh, "b": b}
        layers.append(layer)
    params["lstm"] = layers

    fc_in = 2 * H + embed_size
    fc_scale = 1.0 / float(fc_in) ** 0.5
    fc_w_t = u(next(k), (fc_in, num_classes), fc_scale)              # == torch fc.weight.T
    params["w_fwd"] = fc_w_t[:H]          # rows multiplying the fwd hidden features
    params["w_bwd"] = fc_w_t[H:2 * H]     # rows multiplying the bwd hidden features
    params["w_emb"] = fc_w_t[2 * H:]      # rows multiplying the embedding features
    params["b_fc"] = u(next(k), (1, num_classes), fc_scale)
    return params


if __name__ == "__main__":
    # small config consistent with the module's forward
    n_vocab, embed_size, hidden_size = 100, 16, 32
    layer_num, num_classes = 2, 4
    batch, max_seq_len = 2, 8

    key = jax.random.PRNGKey(0)
    k_tok, k_par = jax.random.split(key)
    token_ids = jax.random.randint(k_tok, (batch, max_seq_len), 0, n_vocab)  # x: (B, L)
    params = init_params(k_par, n_vocab, embed_size, hidden_size, layer_num, num_classes)

    probs = jax.jit(rnn_forward)(token_ids, params)
    probs = jax.block_until_ready(probs)

    assert probs.shape == (batch, num_classes)
    assert bool(jnp.allclose(jnp.sum(probs, axis=1), 1.0, atol=1e-5))
    print("KERNEL_OK")
</pallas_src>

<mosaic_0001>
module attributes {stable_mosaic.version = 11 : i64} {
  func.func @kernel(%arg0: i32, %arg1: memref<2x8x128xf32, #tpu.memory_space<vmem>>, %arg2: memref<2x8x128xf32, #tpu.memory_space<vmem>>, %arg3: memref<32x128xbf16, #tpu.memory_space<vmem>>, %arg4: memref<32x128xbf16, #tpu.memory_space<vmem>>, %arg5: memref<2x1x32xf32, #tpu.memory_space<vmem>>, %arg6: memref<2x1x32xf32, #tpu.memory_space<vmem>>, %arg7: memref<8x32xf32, #tpu.memory_space<vmem>>, %arg8: memref<8x32xf32, #tpu.memory_space<vmem>>, %arg9: memref<8x32xf32, #tpu.memory_space<vmem>>, %arg10: memref<8x32xf32, #tpu.memory_space<vmem>>) attributes {dimension_semantics = [#tpu.dimension_semantics<arbitrary>], iteration_bounds = array<i64: 1>, scalar_prefetch = 0 : i64, scratch_operands = 4 : i64, tpu.core_type = #tpu.core_type<tc>, window_params = [{transform_indices = @transform_0, window_bounds = array<i64: 2, 8, 128>}, {transform_indices = @transform_1, window_bounds = array<i64: 2, 8, 128>}, {pipeline_mode = #tpu.pipeline_mode<synchronous>, transform_indices = @transform_2, window_bounds = array<i64: 32, 128>}, {pipeline_mode = #tpu.pipeline_mode<synchronous>, transform_indices = @transform_3, window_bounds = array<i64: 32, 128>}, {transform_indices = @transform_4, window_bounds = array<i64: 2, 1, 32>}, {transform_indices = @transform_5, window_bounds = array<i64: 2, 1, 32>}]} {
    %c0_i32 = arith.constant 0 : i32
    %0 = arith.cmpi eq, %arg0, %c0_i32 : i32
    %1 = arith.extui %0 : i1 to i32
    %c0_i32_0 = arith.constant 0 : i32
    %2 = arith.cmpi ne, %1, %c0_i32_0 : i32
    scf.if %2 {
      %cst_78 = arith.constant 0.000000e+00 : f32
      %173 = vector.broadcast %cst_78 : f32 to vector<8x32xf32>
      %c0_79 = arith.constant 0 : index
      %c0_80 = arith.constant 0 : index
      %174 = vector.load %arg7[%c0_79, %c0_80] : memref<8x32xf32, #tpu.memory_space<vmem>>, vector<8x32xf32>
      tpu.vector_store %arg7[%c0_79, %c0_80], %173 {strides = array<i32>} : memref<8x32xf32, #tpu.memory_space<vmem>>, vector<8x32xf32>,
      %cst_81 = arith.constant 0.000000e+00 : f32
      %175 = vector.broadcast %cst_81 : f32 to vector<8x32xf32>
      %c0_82 = arith.constant 0 : index
      %c0_83 = arith.constant 0 : index
      %176 = vector.load %arg8[%c0_82, %c0_83] : memref<8x32xf32, #tpu.memory_space<vmem>>, vector<8x32xf32>
      tpu.vector_store %arg8[%c0_82, %c0_83], %175 {strides = array<i32>} : memref<8x32xf32, #tpu.memory_space<vmem>>, vector<8x32xf32>,
      %cst_84 = arith.constant 0.000000e+00 : f32
      %177 = vector.broadcast %cst_84 : f32 to vector<8x32xf32>
      %c0_85 = arith.constant 0 : index
      %c0_86 = arith.constant 0 : index
      %178 = vector.load %arg9[%c0_85, %c0_86] : memref<8x32xf32, #tpu.memory_space<vmem>>, vector<8x32xf32>
      tpu.vector_store %arg9[%c0_85, %c0_86], %177 {strides = array<i32>} : memref<8x32xf32, #tpu.memory_space<vmem>>, vector<8x32xf32>,
      %cst_87 = arith.constant 0.000000e+00 : f32
      %179 = vector.broadcast %cst_87 : f32 to vector<8x32xf32>
      %c0_88 = arith.constant 0 : index
      %c0_89 = arith.constant 0 : index
      %180 = vector.load %arg10[%c0_88, %c0_89] : memref<8x32xf32, #tpu.memory_space<vmem>>, vector<8x32xf32>
      tpu.vector_store %arg10[%c0_88, %c0_89], %179 {strides = array<i32>} : memref<8x32xf32, #tpu.memory_space<vmem>>, vector<8x32xf32>,
    } else {
    }
    %c0_i32_1 = arith.constant 0 : i32
    %c1_i32 = arith.constant 1 : i32
    %3 = arith.subi %c1_i32, %c0_i32_1 : i32
    %4 = arith.index_cast %c0_i32_1 : i32 to index
    %c0 = arith.constant 0 : index
    %c0_2 = arith.constant 0 : index
    %5 = vector.load %arg1[%4, %c0, %c0_2] : memref<2x8x128xf32, #tpu.memory_space<vmem>>, vector<1x8x128xf32>
    %6 = vector.shape_cast %5 : vector<1x8x128xf32> to vector<8x128xf32>
    %c0_3 = arith.constant 0 : index
    %c0_4 = arith.constant 0 : index
    %7 = vector.load %arg7[%c0_3, %c0_4] : memref<8x32xf32, #tpu.memory_space<vmem>>, vector<8x32xf32>
    %8 = arith.truncf %7 : vector<8x32xf32> to vector<8x32xbf16>
    %c0_5 = arith.constant 0 : index
    %c0_6 = arith.constant 0 : index
    %9 = vector.load %arg3[%c0_5, %c0_6] : memref<32x128xbf16, #tpu.memory_space<vmem>>, vector<32x128xbf16>
    %cst = arith.constant dense<0.000000e+00> : vector<8x128xf32>
    %10 = tpu.matmul %8, %9, %cst {dimension_numbers = #tpu.dot_dimension_numbers<[1], [0], [0], [1], [0, 0, 1, 1], [], []>} : vector<8x32xbf16>, vector<32x128xbf16>, vector<8x128xf32> -> vector<8x128xf32>
    %11 = arith.addf %6, %10 : vector<8x128xf32>
    %12 = vector.extract_strided_slice %11 {offsets = [0, 0], sizes = [8, 32], strides = [1, 1]} : vector<8x128xf32> to vector<8x32xf32>
    %13 = arith.negf %12 : vector<8x32xf32>
    %14 = math.exp %13 : vector<8x32xf32>
    %cst_7 = arith.constant 1.000000e+00 : f32
    %15 = vector.broadcast %cst_7 : f32 to vector<8x32xf32>
    %16 = arith.addf %15, %14 : vector<8x32xf32>
    %17 = arith.divf %15, %16 : vector<8x32xf32>
    %18 = vector.extract_strided_slice %11 {offsets = [0, 32], sizes = [8, 32], strides = [1, 1]} : vector<8x128xf32> to vector<8x32xf32>
    %19 = arith.negf %18 : vector<8x32xf32>
    %20 = math.exp %19 : vector<8x32xf32>
    %cst_8 = arith.constant 1.000000e+00 : f32
    %21 = vector.broadcast %cst_8 : f32 to vector<8x32xf32>
    %22 = arith.addf %21, %20 : vector<8x32xf32>
    %23 = arith.divf %21, %22 : vector<8x32xf32>
    %24 = vector.extract_strided_slice %11 {offsets = [0, 64], sizes = [8, 32], strides = [1, 1]} : vector<8x128xf32> to vector<8x32xf32>
    %25 = math.tanh %24 : vector<8x32xf32>
    %26 = vector.extract_strided_slice %11 {offsets = [0, 96], sizes = [8, 32], strides = [1, 1]} : vector<8x128xf32> to vector<8x32xf32>
    %27 = arith.negf %26 : vector<8x32xf32>
    %28 = math.exp %27 : vector<8x32xf32>
    %cst_9 = arith.constant 1.000000e+00 : f32
    %29 = vector.broadcast %cst_9 : f32 to vector<8x32xf32>
    %30 = arith.addf %29, %28 : vector<8x32xf32>
    %31 = arith.divf %29, %30 : vector<8x32xf32>
    %c0_10 = arith.constant 0 : index
    %c0_11 = arith.constant 0 : index
    %32 = vector.load %arg8[%c0_10, %c0_11] : memref<8x32xf32, #tpu.memory_space<vmem>>, vector<8x32xf32>
    %33 = arith.mulf %23, %32 : vector<8x32xf32>
    %34 = arith.mulf %17, %25 : vector<8x32xf32>
    %35 = arith.addf %33, %34 : vector<8x32xf32>
    %36 = math.tanh %35 : vector<8x32xf32>
    %37 = arith.mulf %31, %36 : vector<8x32xf32>
    %c0_12 = arith.constant 0 : index
    %c0_13 = arith.constant 0 : index
    %38 = vector.load %arg8[%c0_12, %c0_13] : memref<8x32xf32, #tpu.memory_space<vmem>>, vector<8x32xf32>
    tpu.vector_store %arg8[%c0_12, %c0_13], %35 {strides = array<i32>} : memref<8x32xf32, #tpu.memory_space<vmem>>, vector<8x32xf32>,
    %c0_14 = arith.constant 0 : index
    %c0_15 = arith.constant 0 : index
    %39 = vector.load %arg7[%c0_14, %c0_15] : memref<8x32xf32, #tpu.memory_space<vmem>>, vector<8x32xf32>
    tpu.vector_store %arg7[%c0_14, %c0_15], %37 {strides = array<i32>} : memref<8x32xf32, #tpu.memory_space<vmem>>, vector<8x32xf32>,
    %40 = arith.index_cast %3 : i32 to index
    %c0_16 = arith.constant 0 : index
    %c0_17 = arith.constant 0 : index
    %41 = vector.load %arg2[%40, %c0_16, %c0_17] : memref<2x8x128xf32, #tpu.memory_space<vmem>>, vector<1x8x128xf32>
    %42 = vector.shape_cast %41 : vector<1x8x128xf32> to vector<8x128xf32>
    %c0_18 = arith.constant 0 : index
    %c0_19 = arith.constant 0 : index
    %43 = vector.load %arg9[%c0_18, %c0_19] : memref<8x32xf32, #tpu.memory_space<vmem>>, vector<8x32xf32>
    %44 = arith.truncf %43 : vector<8x32xf32> to vector<8x32xbf16>
    %c0_20 = arith.constant 0 : index
    %c0_21 = arith.constant 0 : index
    %45 = vector.load %arg4[%c0_20, %c0_21] : memref<32x128xbf16, #tpu.memory_space<vmem>>, vector<32x128xbf16>
    %cst_22 = arith.constant dense<0.000000e+00> : vector<8x128xf32>
    %46 = tpu.matmul %44, %45, %cst_22 {dimension_numbers = #tpu.dot_dimension_numbers<[1], [0], [0], [1], [0, 0, 1, 1], [], []>} : vector<8x32xbf16>, vector<32x128xbf16>, vector<8x128xf32> -> vector<8x128xf32>
    %47 = arith.addf %42, %46 : vector<8x128xf32>
    %48 = vector.extract_strided_slice %47 {offsets = [0, 0], sizes = [8, 32], strides = [1, 1]} : vector<8x128xf32> to vector<8x32xf32>
    %49 = arith.negf %48 : vector<8x32xf32>
    %50 = math.exp %49 : vector<8x32xf32>
    %cst_23 = arith.constant 1.000000e+00 : f32
    %51 = vector.broadcast %cst_23 : f32 to vector<8x32xf32>
    %52 = arith.addf %51, %50 : vector<8x32xf32>
    %53 = arith.divf %51, %52 : vector<8x32xf32>
    %54 = vector.extract_strided_slice %47 {offsets = [0, 32], sizes = [8, 32], strides = [1, 1]} : vector<8x128xf32> to vector<8x32xf32>
    %55 = arith.negf %54 : vector<8x32xf32>
    %56 = math.exp %55 : vector<8x32xf32>
    %cst_24 = arith.constant 1.000000e+00 : f32
    %57 = vector.broadcast %cst_24 : f32 to vector<8x32xf32>
    %58 = arith.addf %57, %56 : vector<8x32xf32>
    %59 = arith.divf %57, %58 : vector<8x32xf32>
    %60 = vector.extract_strided_slice %47 {offsets = [0, 64], sizes = [8, 32], strides = [1, 1]} : vector<8x128xf32> to vector<8x32xf32>
    %61 = math.tanh %60 : vector<8x32xf32>
    %62 = vector.extract_strided_slice %47 {offsets = [0, 96], sizes = [8, 32], strides = [1, 1]} : vector<8x128xf32> to vector<8x32xf32>
    %63 = arith.negf %62 : vector<8x32xf32>
    %64 = math.exp %63 : vector<8x32xf32>
    %cst_25 = arith.constant 1.000000e+00 : f32
    %65 = vector.broadcast %cst_25 : f32 to vector<8x32xf32>
    %66 = arith.addf %65, %64 : vector<8x32xf32>
    %67 = arith.divf %65, %66 : vector<8x32xf32>
    %c0_26 = arith.constant 0 : index
    %c0_27 = arith.constant 0 : index
    %68 = vector.load %arg10[%c0_26, %c0_27] : memref<8x32xf32, #tpu.memory_space<vmem>>, vector<8x32xf32>
    %69 = arith.mulf %59, %68 : vector<8x32xf32>
    %70 = arith.mulf %53, %61 : vector<8x32xf32>
    %71 = arith.addf %69, %70 : vector<8x32xf32>
    %72 = math.tanh %71 : vector<8x32xf32>
    %73 = arith.mulf %67, %72 : vector<8x32xf32>
    %c0_28 = arith.constant 0 : index
    %c0_29 = arith.constant 0 : index
    %74 = vector.load %arg10[%c0_28, %c0_29] : memref<8x32xf32, #tpu.memory_space<vmem>>, vector<8x32xf32>
    tpu.vector_store %arg10[%c0_28, %c0_29], %71 {strides = array<i32>} : memref<8x32xf32, #tpu.memory_space<vmem>>, vector<8x32xf32>,
    %c0_30 = arith.constant 0 : index
    %c0_31 = arith.constant 0 : index
    %75 = vector.load %arg9[%c0_30, %c0_31] : memref<8x32xf32, #tpu.memory_space<vmem>>, vector<8x32xf32>
    tpu.vector_store %arg9[%c0_30, %c0_31], %73 {strides = array<i32>} : memref<8x32xf32, #tpu.memory_space<vmem>>, vector<8x32xf32>,
    %cst_32 = arith.constant dense<0xFF800000> : vector<32xf32>
    %76 = vector.multi_reduction <maximumf>, %37, %cst_32 [0] : vector<8x32xf32> to vector<32xf32>
    %77 = vector.shape_cast %76 : vector<32xf32> to vector<1x32xf32>
    %78 = arith.index_cast %c0_i32_1 : i32 to index
    %c0_33 = arith.constant 0 : index
    %c0_34 = arith.constant 0 : index
    %79 = vector.load %arg5[%78, %c0_33, %c0_34] : memref<2x1x32xf32, #tpu.memory_space<vmem>>, vector<1x1x32xf32>
    %80 = vector.shape_cast %79 : vector<1x1x32xf32> to vector<1x32xf32>
    %81 = vector.shape_cast %77 : vector<1x32xf32> to vector<1x1x32xf32>
    tpu.vector_store %arg5[%78, %c0_33, %c0_34], %81 {strides = array<i32>} : memref<2x1x32xf32, #tpu.memory_space<vmem>>, vector<1x1x32xf32>,
    %cst_35 = arith.constant dense<0xFF800000> : vector<32xf32>
    %82 = vector.multi_reduction <maximumf>, %73, %cst_35 [0] : vector<8x32xf32> to vector<32xf32>
    %83 = vector.shape_cast %82 : vector<32xf32> to vector<1x32xf32>
    %84 = arith.index_cast %3 : i32 to index
    %c0_36 = arith.constant 0 : index
    %c0_37 = arith.constant 0 : index
    %85 = vector.load %arg6[%84, %c0_36, %c0_37] : memref<2x1x32xf32, #tpu.memory_space<vmem>>, vector<1x1x32xf32>
    %86 = vector.shape_cast %85 : vector<1x1x32xf32> to vector<1x32xf32>
    %87 = vector.shape_cast %83 : vector<1x32xf32> to vector<1x1x32xf32>
    tpu.vector_store %arg6[%84, %c0_36, %c0_37], %87 {strides = array<i32>} : memref<2x1x32xf32, #tpu.memory_space<vmem>>, vector<1x1x32xf32>,
    %c1_i32_38 = arith.constant 1 : i32
    %c1_i32_39 = arith.constant 1 : i32
    %88 = arith.subi %c1_i32_39, %c1_i32_38 : i32
    %89 = arith.index_cast %c1_i32_38 : i32 to index
    %c0_40 = arith.constant 0 : index
    %c0_41 = arith.constant 0 : index
    %90 = vector.load %arg1[%89, %c0_40, %c0_41] : memref<2x8x128xf32, #tpu.memory_space<vmem>>, vector<1x8x128xf32>
    %91 = vector.shape_cast %90 : vector<1x8x128xf32> to vector<8x128xf32>
    %c0_42 = arith.constant 0 : index
    %c0_43 = arith.constant 0 : index
    %92 = vector.load %arg7[%c0_42, %c0_43] : memref<8x32xf32, #tpu.memory_space<vmem>>, vector<8x32xf32>
    %93 = arith.truncf %92 : vector<8x32xf32> to vector<8x32xbf16>
    %c0_44 = arith.constant 0 : index
    %c0_45 = arith.constant 0 : index
    %94 = vector.load %arg3[%c0_44, %c0_45] : memref<32x128xbf16, #tpu.memory_space<vmem>>, vector<32x128xbf16>
    %cst_46 = arith.constant dense<0.000000e+00> : vector<8x128xf32>
    %95 = tpu.matmul %93, %94, %cst_46 {dimension_numbers = #tpu.dot_dimension_numbers<[1], [0], [0], [1], [0, 0, 1, 1], [], []>} : vector<8x32xbf16>, vector<32x128xbf16>, vector<8x128xf32> -> vector<8x128xf32>
    %96 = arith.addf %91, %95 : vector<8x128xf32>
    %97 = vector.extract_strided_slice %96 {offsets = [0, 0], sizes = [8, 32], strides = [1, 1]} : vector<8x128xf32> to vector<8x32xf32>
    %98 = arith.negf %97 : vector<8x32xf32>
    %99 = math.exp %98 : vector<8x32xf32>
    %cst_47 = arith.constant 1.000000e+00 : f32
    %100 = vector.broadcast %cst_47 : f32 to vector<8x32xf32>
    %101 = arith.addf %100, %99 : vector<8x32xf32>
    %102 = arith.divf %100, %101 : vector<8x32xf32>
    %103 = vector.extract_strided_slice %96 {offsets = [0, 32], sizes = [8, 32], strides = [1, 1]} : vector<8x128xf32> to vector<8x32xf32>
    %104 = arith.negf %103 : vector<8x32xf32>
    %105 = math.exp %104 : vector<8x32xf32>
    %cst_48 = arith.constant 1.000000e+00 : f32
    %106 = vector.broadcast %cst_48 : f32 to vector<8x32xf32>
    %107 = arith.addf %106, %105 : vector<8x32xf32>
    %108 = arith.divf %106, %107 : vector<8x32xf32>
    %109 = vector.extract_strided_slice %96 {offsets = [0, 64], sizes = [8, 32], strides = [1, 1]} : vector<8x128xf32> to vector<8x32xf32>
    %110 = math.tanh %109 : vector<8x32xf32>
    %111 = vector.extract_strided_slice %96 {offsets = [0, 96], sizes = [8, 32], strides = [1, 1]} : vector<8x128xf32> to vector<8x32xf32>
    %112 = arith.negf %111 : vector<8x32xf32>
    %113 = math.exp %112 : vector<8x32xf32>
    %cst_49 = arith.constant 1.000000e+00 : f32
    %114 = vector.broadcast %cst_49 : f32 to vector<8x32xf32>
    %115 = arith.addf %114, %113 : vector<8x32xf32>
    %116 = arith.divf %114, %115 : vector<8x32xf32>
    %c0_50 = arith.constant 0 : index
    %c0_51 = arith.constant 0 : index
    %117 = vector.load %arg8[%c0_50, %c0_51] : memref<8x32xf32, #tpu.memory_space<vmem>>, vector<8x32xf32>
    %118 = arith.mulf %108, %117 : vector<8x32xf32>
    %119 = arith.mulf %102, %110 : vector<8x32xf32>
    %120 = arith.addf %118, %119 : vector<8x32xf32>
    %121 = math.tanh %120 : vector<8x32xf32>
    %122 = arith.mulf %116, %121 : vector<8x32xf32>
    %c0_52 = arith.constant 0 : index
    %c0_53 = arith.constant 0 : index
    %123 = vector.load %arg8[%c0_52, %c0_53] : memref<8x32xf32, #tpu.memory_space<vmem>>, vector<8x32xf32>
    tpu.vector_store %arg8[%c0_52, %c0_53], %120 {strides = array<i32>} : memref<8x32xf32, #tpu.memory_space<vmem>>, vector<8x32xf32>,
    %c0_54 = arith.constant 0 : index
    %c0_55 = arith.constant 0 : index
    %124 = vector.load %arg7[%c0_54, %c0_55] : memref<8x32xf32, #tpu.memory_space<vmem>>, vector<8x32xf32>
    tpu.vector_store %arg7[%c0_54, %c0_55], %122 {strides = array<i32>} : memref<8x32xf32, #tpu.memory_space<vmem>>, vector<8x32xf32>,
    %125 = arith.index_cast %88 : i32 to index
    %c0_56 = arith.constant 0 : index
    %c0_57 = arith.constant 0 : index
    %126 = vector.load %arg2[%125, %c0_56, %c0_57] : memref<2x8x128xf32, #tpu.memory_space<vmem>>, vector<1x8x128xf32>
    %127 = vector.shape_cast %126 : vector<1x8x128xf32> to vector<8x128xf32>
    %c0_58 = arith.constant 0 : index
    %c0_59 = arith.constant 0 : index
    %128 = vector.load %arg9[%c0_58, %c0_59] : memref<8x32xf32, #tpu.memory_space<vmem>>, vector<8x32xf32>
    %129 = arith.truncf %128 : vector<8x32xf32> to vector<8x32xbf16>
    %c0_60 = arith.constant 0 : index
    %c0_61 = arith.constant 0 : index
    %130 = vector.load %arg4[%c0_60, %c0_61] : memref<32x128xbf16, #tpu.memory_space<vmem>>, vector<32x128xbf16>
    %cst_62 = arith.constant dense<0.000000e+00> : vector<8x128xf32>
    %131 = tpu.matmul %129, %130, %cst_62 {dimension_numbers = #tpu.dot_dimension_numbers<[1], [0], [0], [1], [0, 0, 1, 1], [], []>} : vector<8x32xbf16>, vector<32x128xbf16>, vector<8x128xf32> -> vector<8x128xf32>
    %132 = arith.addf %127, %131 : vector<8x128xf32>
    %133 = vector.extract_strided_slice %132 {offsets = [0, 0], sizes = [8, 32], strides = [1, 1]} : vector<8x128xf32> to vector<8x32xf32>
    %134 = arith.negf %133 : vector<8x32xf32>
    %135 = math.exp %134 : vector<8x32xf32>
    %cst_63 = arith.constant 1.000000e+00 : f32
    %136 = vector.broadcast %cst_63 : f32 to vector<8x32xf32>
    %137 = arith.addf %136, %135 : vector<8x32xf32>
    %138 = arith.divf %136, %137 : vector<8x32xf32>
    %139 = vector.extract_strided_slice %132 {offsets = [0, 32], sizes = [8, 32], strides = [1, 1]} : vector<8x128xf32> to vector<8x32xf32>
    %140 = arith.negf %139 : vector<8x32xf32>
    %141 = math.exp %140 : vector<8x32xf32>
    %cst_64 = arith.constant 1.000000e+00 : f32
    %142 = vector.broadcast %cst_64 : f32 to vector<8x32xf32>
    %143 = arith.addf %142, %141 : vector<8x32xf32>
    %144 = arith.divf %142, %143 : vector<8x32xf32>
    %145 = vector.extract_strided_slice %132 {offsets = [0, 64], sizes = [8, 32], strides = [1, 1]} : vector<8x128xf32> to vector<8x32xf32>
    %146 = math.tanh %145 : vector<8x32xf32>
    %147 = vector.extract_strided_slice %132 {offsets = [0, 96], sizes = [8, 32], strides = [1, 1]} : vector<8x128xf32> to vector<8x32xf32>
    %148 = arith.negf %147 : vector<8x32xf32>
    %149 = math.exp %148 : vector<8x32xf32>
    %cst_65 = arith.constant 1.000000e+00 : f32
    %150 = vector.broadcast %cst_65 : f32 to vector<8x32xf32>
    %151 = arith.addf %150, %149 : vector<8x32xf32>
    %152 = arith.divf %150, %151 : vector<8x32xf32>
    %c0_66 = arith.constant 0 : index
    %c0_67 = arith.constant 0 : index
    %153 = vector.load %arg10[%c0_66, %c0_67] : memref<8x32xf32, #tpu.memory_space<vmem>>, vector<8x32xf32>
    %154 = arith.mulf %144, %153 : vector<8x32xf32>
    %155 = arith.mulf %138, %146 : vector<8x32xf32>
    %156 = arith.addf %154, %155 : vector<8x32xf32>
    %157 = math.tanh %156 : vector<8x32xf32>
    %158 = arith.mulf %152, %157 : vector<8x32xf32>
    %c0_68 = arith.constant 0 : index
    %c0_69 = arith.constant 0 : index
    %159 = vector.load %arg10[%c0_68, %c0_69] : memref<8x32xf32, #tpu.memory_space<vmem>>, vector<8x32xf32>
    tpu.vector_store %arg10[%c0_68, %c0_69], %156 {strides = array<i32>} : memref<8x32xf32, #tpu.memory_space<vmem>>, vector<8x32xf32>,
    %c0_70 = arith.constant 0 : index
    %c0_71 = arith.constant 0 : index
    %160 = vector.load %arg9[%c0_70, %c0_71] : memref<8x32xf32, #tpu.memory_space<vmem>>, vector<8x32xf32>
    tpu.vector_store %arg9[%c0_70, %c0_71], %158 {strides = array<i32>} : memref<8x32xf32, #tpu.memory_space<vmem>>, vector<8x32xf32>,
    %cst_72 = arith.constant dense<0xFF800000> : vector<32xf32>
    %161 = vector.multi_reduction <maximumf>, %122, %cst_72 [0] : vector<8x32xf32> to vector<32xf32>
    %162 = vector.shape_cast %161 : vector<32xf32> to vector<1x32xf32>
    %163 = arith.index_cast %c1_i32_38 : i32 to index
    %c0_73 = arith.constant 0 : index
    %c0_74 = arith.constant 0 : index
    %164 = vector.load %arg5[%163, %c0_73, %c0_74] : memref<2x1x32xf32, #tpu.memory_space<vmem>>, vector<1x1x32xf32>
    %165 = vector.shape_cast %164 : vector<1x1x32xf32> to vector<1x32xf32>
    %166 = vector.shape_cast %162 : vector<1x32xf32> to vector<1x1x32xf32>
    tpu.vector_store %arg5[%163, %c0_73, %c0_74], %166 {strides = array<i32>} : memref<2x1x32xf32, #tpu.memory_space<vmem>>, vector<1x1x32xf32>,
    %cst_75 = arith.constant dense<0xFF800000> : vector<32xf32>
    %167 = vector.multi_reduction <maximumf>, %158, %cst_75 [0] : vector<8x32xf32> to vector<32xf32>
    %168 = vector.shape_cast %167 : vector<32xf32> to vector<1x32xf32>
    %169 = arith.index_cast %88 : i32 to index
    %c0_76 = arith.constant 0 : index
    %c0_77 = arith.constant 0 : index
    %170 = vector.load %arg6[%169, %c0_76, %c0_77] : memref<2x1x32xf32, #tpu.memory_space<vmem>>, vector<1x1x32xf32>
    %171 = vector.shape_cast %170 : vector<1x1x32xf32> to vector<1x32xf32>
    %172 = vector.shape_cast %168 : vector<1x32xf32> to vector<1x1x32xf32>
    tpu.vector_store %arg6[%169, %c0_76, %c0_77], %172 {strides = array<i32>} : memref<2x1x32xf32, #tpu.memory_space<vmem>>, vector<1x1x32xf32>,
    %c2_i32 = arith.constant 2 : i32
    return
  }
  func.func @transform_0(%arg0: i32) -> (i32, i32, i32) {
    %c0_i32 = arith.constant 0 : i32
    %c0_i32_0 = arith.constant 0 : i32
    %c0_i32_1 = arith.constant 0 : i32
    return %arg0, %c0_i32, %c0_i32_0 : i32, i32, i32
  }
  func.func @transform_1(%arg0: i32) -> (i32, i32, i32) {
    %c0_i32 = arith.constant 0 : i32
    %0 = arith.subi %c0_i32, %arg0 : i32
    %c0_i32_0 = arith.constant 0 : i32
    %c0_i32_1 = arith.constant 0 : i32
    %c0_i32_2 = arith.constant 0 : i32
    return %0, %c0_i32_0, %c0_i32_1 : i32, i32, i32
  }
  func.func @transform_2(%arg0: i32) -> (i32, i32) {
    %c0_i32 = arith.constant 0 : i32
    %c0_i32_0 = arith.constant 0 : i32
    %c0_i32_1 = arith.constant 0 : i32
    return %c0_i32, %c0_i32_0 : i32, i32
  }
  func.func @transform_3(%arg0: i32) -> (i32, i32) {
    %c0_i32 = arith.constant 0 : i32
    %c0_i32_0 = arith.constant 0 : i32
    %c0_i32_1 = arith.constant 0 : i32
    return %c0_i32, %c0_i32_0 : i32, i32
  }
  func.func @transform_4(%arg0: i32) -> (i32, i32, i32) {
    %c0_i32 = arith.constant 0 : i32
    %c0_i32_0 = arith.constant 0 : i32
    %c0_i32_1 = arith.constant 0 : i32
    return %arg0, %c0_i32, %c0_i32_0 : i32, i32, i32
  }
  func.func @transform_5(%arg0: i32) -> (i32, i32, i32) {
    %c0_i32 = arith.constant 0 : i32
    %0 = arith.subi %c0_i32, %arg0 : i32
    %c0_i32_0 = arith.constant 0 : i32
    %c0_i32_1 = arith.constant 0 : i32
    %c0_i32_2 = arith.constant 0 : i32
    return %0, %c0_i32_0, %c0_i32_1 : i32, i32, i32
  }
}

module attributes {stable_mosaic.version = 11 : i64} {
  func.func @kernel(%arg0: i32, %arg1: memref<2x8x128xf32, #tpu.memory_space<vmem>>, %arg2: memref<2x8x128xf32, #tpu.memory_space<vmem>>, %arg3: memref<32x128xbf16, #tpu.memory_space<vmem>>, %arg4: memref<32x128xbf16, #tpu.memory_space<vmem>>, %arg5: memref<2x8x32xbf16, #tpu.memory_space<vmem>>, %arg6: memref<2x8x32xbf16, #tpu.memory_space<vmem>>, %arg7: memref<8x32xf32, #tpu.memory_space<vmem>>, %arg8: memref<8x32xf32, #tpu.memory_space<vmem>>, %arg9: memref<8x32xf32, #tpu.memory_space<vmem>>, %arg10: memref<8x32xf32, #tpu.memory_space<vmem>>) attributes {dimension_semantics = [#tpu.dimension_semantics<arbitrary>], iteration_bounds = array<i64: 1>, scalar_prefetch = 0 : i64, scratch_operands = 4 : i64, tpu.core_type = #tpu.core_type<tc>, window_params = [{transform_indices = @transform_0, window_bounds = array<i64: 2, 8, 128>}, {transform_indices = @transform_1, window_bounds = array<i64: 2, 8, 128>}, {pipeline_mode = #tpu.pipeline_mode<synchronous>, transform_indices = @transform_2, window_bounds = array<i64: 32, 128>}, {pipeline_mode = #tpu.pipeline_mode<synchronous>, transform_indices = @transform_3, window_bounds = array<i64: 32, 128>}, {transform_indices = @transform_4, window_bounds = array<i64: 2, 8, 32>}, {transform_indices = @transform_5, window_bounds = array<i64: 2, 8, 32>}]} {
    %c0_i32 = arith.constant 0 : i32
    %0 = arith.cmpi eq, %arg0, %c0_i32 : i32
    %1 = arith.extui %0 : i1 to i32
    %c0_i32_0 = arith.constant 0 : i32
    %2 = arith.cmpi ne, %1, %c0_i32_0 : i32
    scf.if %2 {
      %cst_74 = arith.constant 0.000000e+00 : f32
      %169 = vector.broadcast %cst_74 : f32 to vector<8x32xf32>
      %c0_75 = arith.constant 0 : index
      %c0_76 = arith.constant 0 : index
      %170 = vector.load %arg7[%c0_75, %c0_76] : memref<8x32xf32, #tpu.memory_space<vmem>>, vector<8x32xf32>
      tpu.vector_store %arg7[%c0_75, %c0_76], %169 {strides = array<i32>} : memref<8x32xf32, #tpu.memory_space<vmem>>, vector<8x32xf32>,
      %cst_77 = arith.constant 0.000000e+00 : f32
      %171 = vector.broadcast %cst_77 : f32 to vector<8x32xf32>
      %c0_78 = arith.constant 0 : index
      %c0_79 = arith.constant 0 : index
      %172 = vector.load %arg8[%c0_78, %c0_79] : memref<8x32xf32, #tpu.memory_space<vmem>>, vector<8x32xf32>
      tpu.vector_store %arg8[%c0_78, %c0_79], %171 {strides = array<i32>} : memref<8x32xf32, #tpu.memory_space<vmem>>, vector<8x32xf32>,
      %cst_80 = arith.constant 0.000000e+00 : f32
      %173 = vector.broadcast %cst_80 : f32 to vector<8x32xf32>
      %c0_81 = arith.constant 0 : index
      %c0_82 = arith.constant 0 : index
      %174 = vector.load %arg9[%c0_81, %c0_82] : memref<8x32xf32, #tpu.memory_space<vmem>>, vector<8x32xf32>
      tpu.vector_store %arg9[%c0_81, %c0_82], %173 {strides = array<i32>} : memref<8x32xf32, #tpu.memory_space<vmem>>, vector<8x32xf32>,
      %cst_83 = arith.constant 0.000000e+00 : f32
      %175 = vector.broadcast %cst_83 : f32 to vector<8x32xf32>
      %c0_84 = arith.constant 0 : index
      %c0_85 = arith.constant 0 : index
      %176 = vector.load %arg10[%c0_84, %c0_85] : memref<8x32xf32, #tpu.memory_space<vmem>>, vector<8x32xf32>
      tpu.vector_store %arg10[%c0_84, %c0_85], %175 {strides = array<i32>} : memref<8x32xf32, #tpu.memory_space<vmem>>, vector<8x32xf32>,
    } else {
    }
    %c0_i32_1 = arith.constant 0 : i32
    %c1_i32 = arith.constant 1 : i32
    %3 = arith.subi %c1_i32, %c0_i32_1 : i32
    %4 = arith.index_cast %c0_i32_1 : i32 to index
    %c0 = arith.constant 0 : index
    %c0_2 = arith.constant 0 : index
    %5 = vector.load %arg1[%4, %c0, %c0_2] : memref<2x8x128xf32, #tpu.memory_space<vmem>>, vector<1x8x128xf32>
    %6 = vector.shape_cast %5 : vector<1x8x128xf32> to vector<8x128xf32>
    %c0_3 = arith.constant 0 : index
    %c0_4 = arith.constant 0 : index
    %7 = vector.load %arg7[%c0_3, %c0_4] : memref<8x32xf32, #tpu.memory_space<vmem>>, vector<8x32xf32>
    %8 = arith.truncf %7 : vector<8x32xf32> to vector<8x32xbf16>
    %c0_5 = arith.constant 0 : index
    %c0_6 = arith.constant 0 : index
    %9 = vector.load %arg3[%c0_5, %c0_6] : memref<32x128xbf16, #tpu.memory_space<vmem>>, vector<32x128xbf16>
    %cst = arith.constant dense<0.000000e+00> : vector<8x128xf32>
    %10 = tpu.matmul %8, %9, %cst {dimension_numbers = #tpu.dot_dimension_numbers<[1], [0], [0], [1], [0, 0, 1, 1], [], []>} : vector<8x32xbf16>, vector<32x128xbf16>, vector<8x128xf32> -> vector<8x128xf32>
    %11 = arith.addf %6, %10 : vector<8x128xf32>
    %12 = vector.extract_strided_slice %11 {offsets = [0, 0], sizes = [8, 32], strides = [1, 1]} : vector<8x128xf32> to vector<8x32xf32>
    %13 = arith.negf %12 : vector<8x32xf32>
    %14 = math.exp %13 : vector<8x32xf32>
    %cst_7 = arith.constant 1.000000e+00 : f32
    %15 = vector.broadcast %cst_7 : f32 to vector<8x32xf32>
    %16 = arith.addf %15, %14 : vector<8x32xf32>
    %17 = arith.divf %15, %16 : vector<8x32xf32>
    %18 = vector.extract_strided_slice %11 {offsets = [0, 32], sizes = [8, 32], strides = [1, 1]} : vector<8x128xf32> to vector<8x32xf32>
    %19 = arith.negf %18 : vector<8x32xf32>
    %20 = math.exp %19 : vector<8x32xf32>
    %cst_8 = arith.constant 1.000000e+00 : f32
    %21 = vector.broadcast %cst_8 : f32 to vector<8x32xf32>
    %22 = arith.addf %21, %20 : vector<8x32xf32>
    %23 = arith.divf %21, %22 : vector<8x32xf32>
    %24 = vector.extract_strided_slice %11 {offsets = [0, 64], sizes = [8, 32], strides = [1, 1]} : vector<8x128xf32> to vector<8x32xf32>
    %25 = math.tanh %24 : vector<8x32xf32>
    %26 = vector.extract_strided_slice %11 {offsets = [0, 96], sizes = [8, 32], strides = [1, 1]} : vector<8x128xf32> to vector<8x32xf32>
    %27 = arith.negf %26 : vector<8x32xf32>
    %28 = math.exp %27 : vector<8x32xf32>
    %cst_9 = arith.constant 1.000000e+00 : f32
    %29 = vector.broadcast %cst_9 : f32 to vector<8x32xf32>
    %30 = arith.addf %29, %28 : vector<8x32xf32>
    %31 = arith.divf %29, %30 : vector<8x32xf32>
    %c0_10 = arith.constant 0 : index
    %c0_11 = arith.constant 0 : index
    %32 = vector.load %arg8[%c0_10, %c0_11] : memref<8x32xf32, #tpu.memory_space<vmem>>, vector<8x32xf32>
    %33 = arith.mulf %23, %32 : vector<8x32xf32>
    %34 = arith.mulf %17, %25 : vector<8x32xf32>
    %35 = arith.addf %33, %34 : vector<8x32xf32>
    %36 = math.tanh %35 : vector<8x32xf32>
    %37 = arith.mulf %31, %36 : vector<8x32xf32>
    %c0_12 = arith.constant 0 : index
    %c0_13 = arith.constant 0 : index
    %38 = vector.load %arg8[%c0_12, %c0_13] : memref<8x32xf32, #tpu.memory_space<vmem>>, vector<8x32xf32>
    tpu.vector_store %arg8[%c0_12, %c0_13], %35 {strides = array<i32>} : memref<8x32xf32, #tpu.memory_space<vmem>>, vector<8x32xf32>,
    %c0_14 = arith.constant 0 : index
    %c0_15 = arith.constant 0 : index
    %39 = vector.load %arg7[%c0_14, %c0_15] : memref<8x32xf32, #tpu.memory_space<vmem>>, vector<8x32xf32>
    tpu.vector_store %arg7[%c0_14, %c0_15], %37 {strides = array<i32>} : memref<8x32xf32, #tpu.memory_space<vmem>>, vector<8x32xf32>,
    %40 = arith.index_cast %3 : i32 to index
    %c0_16 = arith.constant 0 : index
    %c0_17 = arith.constant 0 : index
    %41 = vector.load %arg2[%40, %c0_16, %c0_17] : memref<2x8x128xf32, #tpu.memory_space<vmem>>, vector<1x8x128xf32>
    %42 = vector.shape_cast %41 : vector<1x8x128xf32> to vector<8x128xf32>
    %c0_18 = arith.constant 0 : index
    %c0_19 = arith.constant 0 : index
    %43 = vector.load %arg9[%c0_18, %c0_19] : memref<8x32xf32, #tpu.memory_space<vmem>>, vector<8x32xf32>
    %44 = arith.truncf %43 : vector<8x32xf32> to vector<8x32xbf16>
    %c0_20 = arith.constant 0 : index
    %c0_21 = arith.constant 0 : index
    %45 = vector.load %arg4[%c0_20, %c0_21] : memref<32x128xbf16, #tpu.memory_space<vmem>>, vector<32x128xbf16>
    %cst_22 = arith.constant dense<0.000000e+00> : vector<8x128xf32>
    %46 = tpu.matmul %44, %45, %cst_22 {dimension_numbers = #tpu.dot_dimension_numbers<[1], [0], [0], [1], [0, 0, 1, 1], [], []>} : vector<8x32xbf16>, vector<32x128xbf16>, vector<8x128xf32> -> vector<8x128xf32>
    %47 = arith.addf %42, %46 : vector<8x128xf32>
    %48 = vector.extract_strided_slice %47 {offsets = [0, 0], sizes = [8, 32], strides = [1, 1]} : vector<8x128xf32> to vector<8x32xf32>
    %49 = arith.negf %48 : vector<8x32xf32>
    %50 = math.exp %49 : vector<8x32xf32>
    %cst_23 = arith.constant 1.000000e+00 : f32
    %51 = vector.broadcast %cst_23 : f32 to vector<8x32xf32>
    %52 = arith.addf %51, %50 : vector<8x32xf32>
    %53 = arith.divf %51, %52 : vector<8x32xf32>
    %54 = vector.extract_strided_slice %47 {offsets = [0, 32], sizes = [8, 32], strides = [1, 1]} : vector<8x128xf32> to vector<8x32xf32>
    %55 = arith.negf %54 : vector<8x32xf32>
    %56 = math.exp %55 : vector<8x32xf32>
    %cst_24 = arith.constant 1.000000e+00 : f32
    %57 = vector.broadcast %cst_24 : f32 to vector<8x32xf32>
    %58 = arith.addf %57, %56 : vector<8x32xf32>
    %59 = arith.divf %57, %58 : vector<8x32xf32>
    %60 = vector.extract_strided_slice %47 {offsets = [0, 64], sizes = [8, 32], strides = [1, 1]} : vector<8x128xf32> to vector<8x32xf32>
    %61 = math.tanh %60 : vector<8x32xf32>
    %62 = vector.extract_strided_slice %47 {offsets = [0, 96], sizes = [8, 32], strides = [1, 1]} : vector<8x128xf32> to vector<8x32xf32>
    %63 = arith.negf %62 : vector<8x32xf32>
    %64 = math.exp %63 : vector<8x32xf32>
    %cst_25 = arith.constant 1.000000e+00 : f32
    %65 = vector.broadcast %cst_25 : f32 to vector<8x32xf32>
    %66 = arith.addf %65, %64 : vector<8x32xf32>
    %67 = arith.divf %65, %66 : vector<8x32xf32>
    %c0_26 = arith.constant 0 : index
    %c0_27 = arith.constant 0 : index
    %68 = vector.load %arg10[%c0_26, %c0_27] : memref<8x32xf32, #tpu.memory_space<vmem>>, vector<8x32xf32>
    %69 = arith.mulf %59, %68 : vector<8x32xf32>
    %70 = arith.mulf %53, %61 : vector<8x32xf32>
    %71 = arith.addf %69, %70 : vector<8x32xf32>
    %72 = math.tanh %71 : vector<8x32xf32>
    %73 = arith.mulf %67, %72 : vector<8x32xf32>
    %c0_28 = arith.constant 0 : index
    %c0_29 = arith.constant 0 : index
    %74 = vector.load %arg10[%c0_28, %c0_29] : memref<8x32xf32, #tpu.memory_space<vmem>>, vector<8x32xf32>
    tpu.vector_store %arg10[%c0_28, %c0_29], %71 {strides = array<i32>} : memref<8x32xf32, #tpu.memory_space<vmem>>, vector<8x32xf32>,
    %c0_30 = arith.constant 0 : index
    %c0_31 = arith.constant 0 : index
    %75 = vector.load %arg9[%c0_30, %c0_31] : memref<8x32xf32, #tpu.memory_space<vmem>>, vector<8x32xf32>
    tpu.vector_store %arg9[%c0_30, %c0_31], %73 {strides = array<i32>} : memref<8x32xf32, #tpu.memory_space<vmem>>, vector<8x32xf32>,
    %76 = arith.truncf %37 : vector<8x32xf32> to vector<8x32xbf16>
    %77 = arith.index_cast %c0_i32_1 : i32 to index
    %c0_32 = arith.constant 0 : index
    %c0_33 = arith.constant 0 : index
    %78 = vector.load %arg5[%77, %c0_32, %c0_33] : memref<2x8x32xbf16, #tpu.memory_space<vmem>>, vector<1x8x32xbf16>
    %79 = vector.shape_cast %78 : vector<1x8x32xbf16> to vector<8x32xbf16>
    %80 = vector.shape_cast %76 : vector<8x32xbf16> to vector<1x8x32xbf16>
    tpu.vector_store %arg5[%77, %c0_32, %c0_33], %80 {strides = array<i32>} : memref<2x8x32xbf16, #tpu.memory_space<vmem>>, vector<1x8x32xbf16>,
    %81 = arith.truncf %73 : vector<8x32xf32> to vector<8x32xbf16>
    %82 = arith.index_cast %3 : i32 to index
    %c0_34 = arith.constant 0 : index
    %c0_35 = arith.constant 0 : index
    %83 = vector.load %arg6[%82, %c0_34, %c0_35] : memref<2x8x32xbf16, #tpu.memory_space<vmem>>, vector<1x8x32xbf16>
    %84 = vector.shape_cast %83 : vector<1x8x32xbf16> to vector<8x32xbf16>
    %85 = vector.shape_cast %81 : vector<8x32xbf16> to vector<1x8x32xbf16>
    tpu.vector_store %arg6[%82, %c0_34, %c0_35], %85 {strides = array<i32>} : memref<2x8x32xbf16, #tpu.memory_space<vmem>>, vector<1x8x32xbf16>,
    %c1_i32_36 = arith.constant 1 : i32
    %c1_i32_37 = arith.constant 1 : i32
    %86 = arith.subi %c1_i32_37, %c1_i32_36 : i32
    %87 = arith.index_cast %c1_i32_36 : i32 to index
    %c0_38 = arith.constant 0 : index
    %c0_39 = arith.constant 0 : index
    %88 = vector.load %arg1[%87, %c0_38, %c0_39] : memref<2x8x128xf32, #tpu.memory_space<vmem>>, vector<1x8x128xf32>
    %89 = vector.shape_cast %88 : vector<1x8x128xf32> to vector<8x128xf32>
    %c0_40 = arith.constant 0 : index
    %c0_41 = arith.constant 0 : index
    %90 = vector.load %arg7[%c0_40, %c0_41] : memref<8x32xf32, #tpu.memory_space<vmem>>, vector<8x32xf32>
    %91 = arith.truncf %90 : vector<8x32xf32> to vector<8x32xbf16>
    %c0_42 = arith.constant 0 : index
    %c0_43 = arith.constant 0 : index
    %92 = vector.load %arg3[%c0_42, %c0_43] : memref<32x128xbf16, #tpu.memory_space<vmem>>, vector<32x128xbf16>
    %cst_44 = arith.constant dense<0.000000e+00> : vector<8x128xf32>
    %93 = tpu.matmul %91, %92, %cst_44 {dimension_numbers = #tpu.dot_dimension_numbers<[1], [0], [0], [1], [0, 0, 1, 1], [], []>} : vector<8x32xbf16>, vector<32x128xbf16>, vector<8x128xf32> -> vector<8x128xf32>
    %94 = arith.addf %89, %93 : vector<8x128xf32>
    %95 = vector.extract_strided_slice %94 {offsets = [0, 0], sizes = [8, 32], strides = [1, 1]} : vector<8x128xf32> to vector<8x32xf32>
    %96 = arith.negf %95 : vector<8x32xf32>
    %97 = math.exp %96 : vector<8x32xf32>
    %cst_45 = arith.constant 1.000000e+00 : f32
    %98 = vector.broadcast %cst_45 : f32 to vector<8x32xf32>
    %99 = arith.addf %98, %97 : vector<8x32xf32>
    %100 = arith.divf %98, %99 : vector<8x32xf32>
    %101 = vector.extract_strided_slice %94 {offsets = [0, 32], sizes = [8, 32], strides = [1, 1]} : vector<8x128xf32> to vector<8x32xf32>
    %102 = arith.negf %101 : vector<8x32xf32>
    %103 = math.exp %102 : vector<8x32xf32>
    %cst_46 = arith.constant 1.000000e+00 : f32
    %104 = vector.broadcast %cst_46 : f32 to vector<8x32xf32>
    %105 = arith.addf %104, %103 : vector<8x32xf32>
    %106 = arith.divf %104, %105 : vector<8x32xf32>
    %107 = vector.extract_strided_slice %94 {offsets = [0, 64], sizes = [8, 32], strides = [1, 1]} : vector<8x128xf32> to vector<8x32xf32>
    %108 = math.tanh %107 : vector<8x32xf32>
    %109 = vector.extract_strided_slice %94 {offsets = [0, 96], sizes = [8, 32], strides = [1, 1]} : vector<8x128xf32> to vector<8x32xf32>
    %110 = arith.negf %109 : vector<8x32xf32>
    %111 = math.exp %110 : vector<8x32xf32>
    %cst_47 = arith.constant 1.000000e+00 : f32
    %112 = vector.broadcast %cst_47 : f32 to vector<8x32xf32>
    %113 = arith.addf %112, %111 : vector<8x32xf32>
    %114 = arith.divf %112, %113 : vector<8x32xf32>
    %c0_48 = arith.constant 0 : index
    %c0_49 = arith.constant 0 : index
    %115 = vector.load %arg8[%c0_48, %c0_49] : memref<8x32xf32, #tpu.memory_space<vmem>>, vector<8x32xf32>
    %116 = arith.mulf %106, %115 : vector<8x32xf32>
    %117 = arith.mulf %100, %108 : vector<8x32xf32>
    %118 = arith.addf %116, %117 : vector<8x32xf32>
    %119 = math.tanh %118 : vector<8x32xf32>
    %120 = arith.mulf %114, %119 : vector<8x32xf32>
    %c0_50 = arith.constant 0 : index
    %c0_51 = arith.constant 0 : index
    %121 = vector.load %arg8[%c0_50, %c0_51] : memref<8x32xf32, #tpu.memory_space<vmem>>, vector<8x32xf32>
    tpu.vector_store %arg8[%c0_50, %c0_51], %118 {strides = array<i32>} : memref<8x32xf32, #tpu.memory_space<vmem>>, vector<8x32xf32>,
    %c0_52 = arith.constant 0 : index
    %c0_53 = arith.constant 0 : index
    %122 = vector.load %arg7[%c0_52, %c0_53] : memref<8x32xf32, #tpu.memory_space<vmem>>, vector<8x32xf32>
    tpu.vector_store %arg7[%c0_52, %c0_53], %120 {strides = array<i32>} : memref<8x32xf32, #tpu.memory_space<vmem>>, vector<8x32xf32>,
    %123 = arith.index_cast %86 : i32 to index
    %c0_54 = arith.constant 0 : index
    %c0_55 = arith.constant 0 : index
    %124 = vector.load %arg2[%123, %c0_54, %c0_55] : memref<2x8x128xf32, #tpu.memory_space<vmem>>, vector<1x8x128xf32>
    %125 = vector.shape_cast %124 : vector<1x8x128xf32> to vector<8x128xf32>
    %c0_56 = arith.constant 0 : index
    %c0_57 = arith.constant 0 : index
    %126 = vector.load %arg9[%c0_56, %c0_57] : memref<8x32xf32, #tpu.memory_space<vmem>>, vector<8x32xf32>
    %127 = arith.truncf %126 : vector<8x32xf32> to vector<8x32xbf16>
    %c0_58 = arith.constant 0 : index
    %c0_59 = arith.constant 0 : index
    %128 = vector.load %arg4[%c0_58, %c0_59] : memref<32x128xbf16, #tpu.memory_space<vmem>>, vector<32x128xbf16>
    %cst_60 = arith.constant dense<0.000000e+00> : vector<8x128xf32>
    %129 = tpu.matmul %127, %128, %cst_60 {dimension_numbers = #tpu.dot_dimension_numbers<[1], [0], [0], [1], [0, 0, 1, 1], [], []>} : vector<8x32xbf16>, vector<32x128xbf16>, vector<8x128xf32> -> vector<8x128xf32>
    %130 = arith.addf %125, %129 : vector<8x128xf32>
    %131 = vector.extract_strided_slice %130 {offsets = [0, 0], sizes = [8, 32], strides = [1, 1]} : vector<8x128xf32> to vector<8x32xf32>
    %132 = arith.negf %131 : vector<8x32xf32>
    %133 = math.exp %132 : vector<8x32xf32>
    %cst_61 = arith.constant 1.000000e+00 : f32
    %134 = vector.broadcast %cst_61 : f32 to vector<8x32xf32>
    %135 = arith.addf %134, %133 : vector<8x32xf32>
    %136 = arith.divf %134, %135 : vector<8x32xf32>
    %137 = vector.extract_strided_slice %130 {offsets = [0, 32], sizes = [8, 32], strides = [1, 1]} : vector<8x128xf32> to vector<8x32xf32>
    %138 = arith.negf %137 : vector<8x32xf32>
    %139 = math.exp %138 : vector<8x32xf32>
    %cst_62 = arith.constant 1.000000e+00 : f32
    %140 = vector.broadcast %cst_62 : f32 to vector<8x32xf32>
    %141 = arith.addf %140, %139 : vector<8x32xf32>
    %142 = arith.divf %140, %141 : vector<8x32xf32>
    %143 = vector.extract_strided_slice %130 {offsets = [0, 64], sizes = [8, 32], strides = [1, 1]} : vector<8x128xf32> to vector<8x32xf32>
    %144 = math.tanh %143 : vector<8x32xf32>
    %145 = vector.extract_strided_slice %130 {offsets = [0, 96], sizes = [8, 32], strides = [1, 1]} : vector<8x128xf32> to vector<8x32xf32>
    %146 = arith.negf %145 : vector<8x32xf32>
    %147 = math.exp %146 : vector<8x32xf32>
    %cst_63 = arith.constant 1.000000e+00 : f32
    %148 = vector.broadcast %cst_63 : f32 to vector<8x32xf32>
    %149 = arith.addf %148, %147 : vector<8x32xf32>
    %150 = arith.divf %148, %149 : vector<8x32xf32>
    %c0_64 = arith.constant 0 : index
    %c0_65 = arith.constant 0 : index
    %151 = vector.load %arg10[%c0_64, %c0_65] : memref<8x32xf32, #tpu.memory_space<vmem>>, vector<8x32xf32>
    %152 = arith.mulf %142, %151 : vector<8x32xf32>
    %153 = arith.mulf %136, %144 : vector<8x32xf32>
    %154 = arith.addf %152, %153 : vector<8x32xf32>
    %155 = math.tanh %154 : vector<8x32xf32>
    %156 = arith.mulf %150, %155 : vector<8x32xf32>
    %c0_66 = arith.constant 0 : index
    %c0_67 = arith.constant 0 : index
    %157 = vector.load %arg10[%c0_66, %c0_67] : memref<8x32xf32, #tpu.memory_space<vmem>>, vector<8x32xf32>
    tpu.vector_store %arg10[%c0_66, %c0_67], %154 {strides = array<i32>} : memref<8x32xf32, #tpu.memory_space<vmem>>, vector<8x32xf32>,
    %c0_68 = arith.constant 0 : index
    %c0_69 = arith.constant 0 : index
    %158 = vector.load %arg9[%c0_68, %c0_69] : memref<8x32xf32, #tpu.memory_space<vmem>>, vector<8x32xf32>
    tpu.vector_store %arg9[%c0_68, %c0_69], %156 {strides = array<i32>} : memref<8x32xf32, #tpu.memory_space<vmem>>, vector<8x32xf32>,
    %159 = arith.truncf %120 : vector<8x32xf32> to vector<8x32xbf16>
    %160 = arith.index_cast %c1_i32_36 : i32 to index
    %c0_70 = arith.constant 0 : index
    %c0_71 = arith.constant 0 : index
    %161 = vector.load %arg5[%160, %c0_70, %c0_71] : memref<2x8x32xbf16, #tpu.memory_space<vmem>>, vector<1x8x32xbf16>
    %162 = vector.shape_cast %161 : vector<1x8x32xbf16> to vector<8x32xbf16>
    %163 = vector.shape_cast %159 : vector<8x32xbf16> to vector<1x8x32xbf16>
    tpu.vector_store %arg5[%160, %c0_70, %c0_71], %163 {strides = array<i32>} : memref<2x8x32xbf16, #tpu.memory_space<vmem>>, vector<1x8x32xbf16>,
    %164 = arith.truncf %156 : vector<8x32xf32> to vector<8x32xbf16>
    %165 = arith.index_cast %86 : i32 to index
    %c0_72 = arith.constant 0 : index
    %c0_73 = arith.constant 0 : index
    %166 = vector.load %arg6[%165, %c0_72, %c0_73] : memref<2x8x32xbf16, #tpu.memory_space<vmem>>, vector<1x8x32xbf16>
    %167 = vector.shape_cast %166 : vector<1x8x32xbf16> to vector<8x32xbf16>
    %168 = vector.shape_cast %164 : vector<8x32xbf16> to vector<1x8x32xbf16>
    tpu.vector_store %arg6[%165, %c0_72, %c0_73], %168 {strides = array<i32>} : memref<2x8x32xbf16, #tpu.memory_space<vmem>>, vector<1x8x32xbf16>,
    %c2_i32 = arith.constant 2 : i32
    return
  }
  func.func @transform_0(%arg0: i32) -> (i32, i32, i32) {
    %c0_i32 = arith.constant 0 : i32
    %c0_i32_0 = arith.constant 0 : i32
    %c0_i32_1 = arith.constant 0 : i32
    return %arg0, %c0_i32, %c0_i32_0 : i32, i32, i32
  }
  func.func @transform_1(%arg0: i32) -> (i32, i32, i32) {
    %c0_i32 = arith.constant 0 : i32
    %0 = arith.subi %c0_i32, %arg0 : i32
    %c0_i32_0 = arith.constant 0 : i32
    %c0_i32_1 = arith.constant 0 : i32
    %c0_i32_2 = arith.constant 0 : i32
    return %0, %c0_i32_0, %c0_i32_1 : i32, i32, i32
  }
  func.func @transform_2(%arg0: i32) -> (i32, i32) {
    %c0_i32 = arith.constant 0 : i32
    %c0_i32_0 = arith.constant 0 : i32
    %c0_i32_1 = arith.constant 0 : i32
    return %c0_i32, %c0_i32_0 : i32, i32
  }
  func.func @transform_3(%arg0: i32) -> (i32, i32) {
    %c0_i32 = arith.constant 0 : i32
    %c0_i32_0 = arith.constant 0 : i32
    %c0_i32_1 = arith.constant 0 : i32
    return %c0_i32, %c0_i32_0 : i32, i32
  }
  func.func @transform_4(%arg0: i32) -> (i32, i32, i32) {
    %c0_i32 = arith.constant 0 : i32
    %c0_i32_0 = arith.constant 0 : i32
    %c0_i32_1 = arith.constant 0 : i32
    return %arg0, %c0_i32, %c0_i32_0 : i32, i32, i32
  }
  func.func @transform_5(%arg0: i32) -> (i32, i32, i32) {
    %c0_i32 = arith.constant 0 : i32
    %0 = arith.subi %c0_i32, %arg0 : i32
    %c0_i32_0 = arith.constant 0 : i32
    %c0_i32_1 = arith.constant 0 : i32
    %c0_i32_2 = arith.constant 0 : i32
    return %0, %c0_i32_0, %c0_i32_1 : i32, i32, i32
  }
}

module attributes {stable_mosaic.version = 11 : i64} {
  func.func @_head_kernel(%arg0: memref<2x32xf32, #tpu.memory_space<vmem>>, %arg1: memref<2x32xf32, #tpu.memory_space<vmem>>, %arg2: memref<2x16xf32, #tpu.memory_space<vmem>>, %arg3: memref<32x4xf32, #tpu.memory_space<vmem>>, %arg4: memref<32x4xf32, #tpu.memory_space<vmem>>, %arg5: memref<16x4xf32, #tpu.memory_space<vmem>>, %arg6: memref<1x4xf32, #tpu.memory_space<vmem>>, %arg7: memref<2x4xf32, #tpu.memory_space<vmem>>) attributes {dimension_semantics = [], scalar_prefetch = 0 : i64, scratch_operands = 0 : i64, tpu.core_type = #tpu.core_type<tc>} {
    %c0 = arith.constant 0 : index
    %c0_0 = arith.constant 0 : index
    %0 = vector.load %arg0[%c0, %c0_0] : memref<2x32xf32, #tpu.memory_space<vmem>>, vector<2x32xf32>
    %c0_1 = arith.constant 0 : index
    %c0_2 = arith.constant 0 : index
    %1 = vector.load %arg3[%c0_1, %c0_2] : memref<32x4xf32, #tpu.memory_space<vmem>>, vector<32x4xf32>
    %cst = arith.constant dense<0.000000e+00> : vector<2x4xf32>
    %2 = tpu.matmul %0, %1, %cst {dimension_numbers = #tpu.dot_dimension_numbers<[1], [0], [0], [1], [0, 0, 1, 1], [], []>} : vector<2x32xf32>, vector<32x4xf32>, vector<2x4xf32> -> vector<2x4xf32>
    %c0_3 = arith.constant 0 : index
    %c0_4 = arith.constant 0 : index
    %3 = vector.load %arg1[%c0_3, %c0_4] : memref<2x32xf32, #tpu.memory_space<vmem>>, vector<2x32xf32>
    %c0_5 = arith.constant 0 : index
    %c0_6 = arith.constant 0 : index
    %4 = vector.load %arg4[%c0_5, %c0_6] : memref<32x4xf32, #tpu.memory_space<vmem>>, vector<32x4xf32>
    %cst_7 = arith.constant dense<0.000000e+00> : vector<2x4xf32>
    %5 = tpu.matmul %3, %4, %cst_7 {dimension_numbers = #tpu.dot_dimension_numbers<[1], [0], [0], [1], [0, 0, 1, 1], [], []>} : vector<2x32xf32>, vector<32x4xf32>, vector<2x4xf32> -> vector<2x4xf32>
    %6 = arith.addf %2, %5 : vector<2x4xf32>
    %c0_8 = arith.constant 0 : index
    %c0_9 = arith.constant 0 : index
    %7 = vector.load %arg2[%c0_8, %c0_9] : memref<2x16xf32, #tpu.memory_space<vmem>>, vector<2x16xf32>
    %c0_10 = arith.constant 0 : index
    %c0_11 = arith.constant 0 : index
    %8 = vector.load %arg5[%c0_10, %c0_11] : memref<16x4xf32, #tpu.memory_space<vmem>>, vector<16x4xf32>
    %cst_12 = arith.constant dense<0.000000e+00> : vector<2x4xf32>
    %9 = tpu.matmul %7, %8, %cst_12 {dimension_numbers = #tpu.dot_dimension_numbers<[1], [0], [0], [1], [0, 0, 1, 1], [], []>} : vector<2x16xf32>, vector<16x4xf32>, vector<2x4xf32> -> vector<2x4xf32>
    %10 = arith.addf %6, %9 : vector<2x4xf32>
    %c0_13 = arith.constant 0 : index
    %c0_14 = arith.constant 0 : index
    %11 = vector.load %arg6[%c0_13, %c0_14] : memref<1x4xf32, #tpu.memory_space<vmem>>, vector<1x4xf32>
    %12 = vector.broadcast %11 : vector<1x4xf32> to vector<2x4xf32>
    %13 = arith.addf %10, %12 : vector<2x4xf32>
    %cst_15 = arith.constant dense<0xFF800000> : vector<2xf32>
    %14 = vector.multi_reduction <maximumf>, %13, %cst_15 [1] : vector<2x4xf32> to vector<2xf32>
    %15 = vector.shape_cast %14 : vector<2xf32> to vector<2x1xf32>
    %16 = vector.broadcast %15 : vector<2x1xf32> to vector<2x4xf32>
    %17 = arith.subf %13, %16 : vector<2x4xf32>
    %18 = math.exp %17 : vector<2x4xf32>
    %cst_16 = arith.constant dense<0.000000e+00> : vector<2xf32>
    %19 = vector.multi_reduction <add>, %18, %cst_16 [1] : vector<2x4xf32> to vector<2xf32>
    %20 = vector.shape_cast %19 : vector<2xf32> to vector<2x1xf32>
    %21 = vector.broadcast %20 : vector<2x1xf32> to vector<2x4xf32>
    %22 = arith.divf %18, %21 : vector<2x4xf32>
    %c0_17 = arith.constant 0 : index
    %c0_18 = arith.constant 0 : index
    %23 = vector.load %arg7[%c0_17, %c0_18] : memref<2x4xf32, #tpu.memory_space<vmem>>, vector<2x4xf32>
    tpu.vector_store %arg7[%c0_17, %c0_18], %22 {strides = array<i32>} : memref<2x4xf32, #tpu.memory_space<vmem>>, vector<2x4xf32>,
    return
  }
}

</mosaic_0001>

<bundles_post_ra>
// kernel: rnn_forward.5
= control target key start
LH: loop header
LB: loop body
LE: loop exit
PB: predicated region body
PF: predicated region fallthrough
CT: control target
= control target key end

     0   :  { %v372_v2 = vmov 0.0   ;;  %s466_s0 = inlined_call_operand.vmem [shape: f32[2,32], index: 0, kind: input, shape index: {}]   ;;  %s467_s1 = inlined_call_operand.vmem [shape: f32[2,32], index: 1, kind: input, shape index: {}]   ;;  %s468_s2 = inlined_call_operand.vmem [shape: f32[2,16], index: 2, kind: input, shape index: {}]   ;;  %s469_s3 = inlined_call_operand.vmem [shape: f32[32,4], index: 3, kind: input, shape index: {}]   ;;  %s470_s4 = inlined_call_operand.vmem [shape: f32[32,4], index: 4, kind: input, shape index: {}]   ;;  %s471_s5 = inlined_call_operand.vmem [shape: f32[16,4], index: 5, kind: input, shape index: {}]   ;;  %s472_s6 = inlined_call_operand.vmem [shape: f32[1,4], index: 6, kind: input, shape index: {}]   ;;  %s473_s7 = inlined_call_operand.hbm [shape: f32[2,4], index: 7, kind: output, shape index: {}]  }
   0x1   :  { %v36_v0 = vld [vmem:[%s470_s4 + $0x18] sm:$0xff]  ;;  %314 = vmatprep.subr.mxu0 %v372_v2  ;;  %325 = vmatprep.subr.mxu1 %v372_v2  ;;  %v35_v3 = vld [vmem:[%s470_s4 + $0x10] sm:$0xff]  ;;  %v34_v5 = vld [vmem:[%s470_s4 + $0x8] sm:$0xff] }
   0x2   :  { %v31_v1 = vld [vmem:[%s469_s3 + $0x18] sm:$0xff]  ;;  %v30_v4 = vld [vmem:[%s469_s3 + $0x10] sm:$0xff]  ;;  %315 = vmatpush3.msra.mxu0 %v36_v0  ;;  %v29_v6 = vld [vmem:[%s469_s3 + $0x8] sm:$0xff] }
   0x3   :  { %326 = vmatpush3.msra.mxu1 %v31_v1  ;;  %316 = vmatprep.subr.mxu0 %v372_v2 }
   0x4   :  { %327 = vmatprep.subr.mxu1 %v372_v2  ;;  %317 = vmatpush3.msra.mxu0 %v35_v3 }
   0x5   :  { %328 = vmatpush3.msra.mxu1 %v30_v4 }
   0x6   :  { %12 = vsyncpa [#allocation3], 0  ;;  %318 = vmatprep.subr.mxu0 %v372_v2  ;;  %329 = vmatprep.subr.mxu1 %v372_v2  ;;  %v33_v7 = vld [vmem:[%s470_s4] sm:$0xff]  ;;  %vm37_vm0 = vcmask 261120   ;;  %vm373_vm1 = vmmov 0   ;;  %v186_v11 = vld [vmem:[%s471_s5 + $0x8] sm:$0xff] }
   0x7   :  { %319 = vmatpush3.msra.mxu0 %v34_v5  ;;  %330 = vmatpush3.msra.mxu1 %v29_v6  ;;  %v32_v8 = vld [vmem:[%s467_s1] sm:$0x3]  ;;  %vm187_vm2 = vcmask 130048   ;;  %vm270_vm3 = vcmask 25600  }
   0x8   :  { %v28_v9 = vld [vmem:[%s469_s3] sm:$0xff]  ;;  %320 = vmatprep.subr.mxu0 %v372_v2  ;;  %322 = vmatprep.mubr.msk.f32.mxu0 %vm373_vm1, %v372_v2 }
   0x9   :  { %321 = vmatpush3.msra.mxu0 %v33_v7  ;;  %331 = vmatprep.subr.mxu1 %v372_v2  ;;  %v27_v10 = vld [vmem:[%s466_s0] sm:$0x3] }
   0xa   :  { %323 = vmatmul.mubr.msk.f32.vlgmr.msra.gmra.mxu0 %vm37_vm0, %v32_v8  ;;  %332 = vmatpush3.msra.mxu1 %v28_v9  ;;  %v185_v12 = vld [vmem:[%s471_s5] sm:$0xff] }
   0xb   :  { %333 = vmatprep.mubr.msk.f32.mxu1 %vm373_vm1, %v372_v2  ;;  %336 = vmatprep.subr.mxu0 %v372_v2  ;;  %v184_v13 = vld [vmem:[%s468_s2] sm:$0x3]  ;;  %s374_s2 = smov [#allocation2]  }
   0xc   :  { %334 = vmatmul.mubr.msk.f32.vlgmr.msra.gmra.mxu1 %vm37_vm0, %v27_v10  ;;  %337 = vmatpush3.msra.mxu0 %v186_v11  ;;  %v300_v20 = vld [vmem:[%s472_s6] ss:$0 sm:$0xff]  ;;  %s289_s24 = sshll.u32 %s374_s2, 4  ;;  %s290_s24 = int_to_ptr.vmem [resolvable:$true] %s289_s24 }
   0xd   :  { %338 = vmatprep.subr.mxu0 %v372_v2  ;;  %340 = vmatprep.mubr.msk.f32.mxu0 %vm373_vm1, %v372_v2  ;;  %s350_s6 = scalar_lea.vmem %s290_s24, 32  ;;  %p355_p1 = scmp.lt.s32.totalorder %s290_s24, %s290_s24 }
   0xe   :  { %339 = vmatpush3.msra.mxu0 %v185_v12  ;;  %p351_p0 = scmp.ne.s32.totalorder %s290_s24, %s350_s6  ;;  %p356_p2 = scmp.lt.s32.totalorder %s350_s6, %s350_s6 }
   0xf   :  { %341 = vmatmul.mubr.msk.f32.vlgmr.msra.gmra.mxu0 %vm187_vm2, %v184_v13 }
  0x10   :  { %p357_p3 = por %p356_p2, %p355_p1 }
  0x12   :  { %p358_p4 = pnand %p357_p3, %p351_p0 }
  0xca   :  { %v107_v14 = vpop.f32.mrf.mxu0 }
  0xcc   :  { %v180_v15 = vpop.f32.mrf.mxu1  ;;  %v324_v16 = vpop.f32.mrf.mxu0 }
  0xcd   :  { %v181_v17 = vadd.f32 %v180_v15, %v107_v14 }
  0xce   :  { %v335_v18 = vpop.f32.mrf.mxu1 }
  0xcf   :  { %v257_v19 = vpop.f32.mrf.mxu0 }
  0xd0   :  { %v261_v21 = vadd.f32 %v257_v19, %v181_v17 }
  0xd1   :  { %v342_v22 = vpop.f32.mrf.mxu0 }
  0xd2   :  { %v269_v23 = vadd.f32 %v300_v20, %v261_v21 }
  0xd4   :  { %v271_v24 = vsel %vm270_vm3, %v269_v23, -inf }
  0xd5   :  { %272 = vmax.xlane.f32.xlu0 %v271_v24 }
 0x15e   :  { %v273_v25 = vpop.xlane.xlu0 %272 }
 0x15f   :  { %v274_v26 = vsub.f32 %v269_v23, %v273_v25 }
 0x161   :  { %v275_v27 = vmul.f32 1.442695, %v274_v26 }
 0x163   :  { %346 = vpow2.f32 %v275_v27 }
 0x170   :  { %v347_v28 = vpop.eup %346 }
 0x171   :  { %v277_v29 = vsel %vm270_vm3, %v347_v28, 0.0 }
 0x172   :  { %278 = vadd.xlane.f32.xlu0 %v277_v29 }
 0x1fb   :  { %v279_v30 = vpop.xlane.xlu0 %278 }
 0x1fc   :  { %348 = vrcp.f32 %v279_v30 }
 0x209   :  { %v349_v31 = vpop.eup %348 }
 0x20a   :  { %v281_v32 = vmul.f32 %v349_v31, %v347_v28 }
 0x20c   :  { %282 = vst.msk [vmem:[#allocation2] sm:$0x3] %vm270_vm3, %v281_v32 }
 0x20d   :  { %361 = shalt.err (!%p358_p4)
}
 0x20e   :  { %292 = dma.vmem_to_hbm [thread:$0]  %s290_s24, 32, %s473_s7, [#allocation3]  }
 0x20f   :  { %370 = dma.done.wait [#allocation3], 32  }
 0x210   :  { %371 = vsyncadd [#allocation3], 4294967264 }
 0x211   :  { %296 = vsyncpa [#allocation3], 1 }

// kernel: rnn_forward.4
= control target key start
LH: loop header
LB: loop body
LE: loop exit
PB: predicated region body
PF: predicated region fallthrough
CT: control target
= control target key end

     0   :  { %vm58_vm0 = vcmask 261120   ;;  %v665_v0 = vmov 0.0   ;;  %vm666_vm1 = vmmov 0   ;;  %s667_s26 = smov 32   ;;  %s668_s6 = smov 64   ;;  %vm269_vm2 = vcmask 1048320   ;;  %s828_s2 = inlined_call_operand.vmem [shape: bf16[32,128], index: 2, kind: input, shape index: {}]   ;;  %s829_s3 = inlined_call_operand.vmem [shape: bf16[32,128], index: 3, kind: input, shape index: {}]   ;;  %s830_s0 = inlined_call_operand.vmem [shape: f32[2,8,128], index: 0, kind: input, shape index: {}]   ;;  %s831_s1 = inlined_call_operand.vmem [shape: f32[2,8,128], index: 1, kind: input, shape index: {}]   ;;  %s832_s4 = inlined_call_operand.vmem [shape: f32[2,1,32], index: 4, kind: output, shape index: {0}]   ;;  %s833_s5 = inlined_call_operand.vmem [shape: f32[2,1,32], index: 5, kind: output, shape index: {1}]  }
   0x1   :  { %588 = vmatprep.subr.bf16.mxu0 %v665_v0  ;;  %596 = vmatprep.subr.bf16.mxu1 %v665_v0  ;;  %v625_v1 = vld [vmem:[%s828_s2 + $0x8] sm:$0xff]   ;;  %59 = vst.msk [vmem:[#allocation2] sm:$0xff] %vm58_vm0, %v665_v0  ;;  %60 = vst.msk [vmem:[#allocation3] sm:$0xff] %vm58_vm0, %v665_v0  ;;  %v627_v3 = vld [vmem:[%s828_s2] sm:$0xff]   ;;  %vm281_vm3 = vcmask 253952  }
   0x2   :  { %61 = vst.msk [vmem:[#allocation4] sm:$0xff] %vm58_vm0, %v665_v0  ;;  %62 = vst.msk [vmem:[#allocation5] sm:$0xff] %vm58_vm0, %v665_v0  ;;  %v626_v2 = vld [vmem:[%s829_s3 + $0x8] sm:$0xff]   ;;  %592 = vmatprep.mubr.msk.bf16.mxu0 %vm666_vm1, %v665_v0  ;;  %600 = vmatprep.mubr.msk.bf16.mxu1 %vm666_vm1, %v665_v0  ;;  %v628_v4 = vld [vmem:[%s829_s3] sm:$0xff]  }
   0x3   :  { %589 = vmatpush3.bf16.msra.mxu0 %v625_v1  ;;  %597 = vmatpush3.bf16.msra.mxu1 %v626_v2  ;;  %v63_v11 = vld [vmem:[%s830_s0] sm:$0xff]  ;;  %v560_v12 = vld [vmem:[%s831_s1 + $0x8] sm:$0xff] }
   0x4   :  { %590 = vmatprep.subr.bf16.mxu0 %v665_v0  ;;  %598 = vmatprep.subr.bf16.mxu1 %v665_v0  ;;  %v629_v47 = vld [vmem:[%s828_s2 + $0x8] sm:$0xff]   ;;  %v631_v49 = vld [vmem:[%s828_s2] sm:$0xff]   ;;  %s669_s2 = smov 96  }
   0x5   :  { %v630_v48 = vld [vmem:[%s829_s3 + $0x8] sm:$0xff]   ;;  %v632_v50 = vld [vmem:[%s829_s3] sm:$0xff]  }
   0x6   :  { %v566_v63 = vld [vmem:[%s830_s0 + $0x8] sm:$0xff] }
   0x7   :  { %591 = vmatpush3.bf16.msra.mxu0 %v627_v3  ;;  %599 = vmatpush3.bf16.msra.mxu1 %v628_v4  ;;  %v399_v3 = vld [vmem:[%s831_s1] sm:$0xff] }
   0x8   :  { %v64_v5 = vld [vmem:[#allocation2] sm:$0xff]  ;;  %v134_v7 = vld [vmem:[#allocation3] sm:$0xff]  ;;  %604 = vmatprep.subr.bf16.mxu0 %v665_v0  ;;  %612 = vmatprep.subr.bf16.mxu1 %v665_v0 }
   0x9   :  { %v168_v6 = vld [vmem:[#allocation4] sm:$0xff]  ;;  %v65_v8 = vpack.c.bf16 %v64_v5, %v64_v5  ;;  %136 = vrot.lane.b32.xlu1 %v134_v7, %s667_s26  ;;  %v237_v10 = vld [vmem:[#allocation5] sm:$0xff] }
   0xa   :  { %v169_v9 = vpack.c.bf16 %v168_v6, %v168_v6 }
   0xb   :  { %593 = vmatmul.mubr.msk.bf16.vlgmr.msra.gmra.mxu0 %vm58_vm0, %v65_v8 }
   0xc   :  { %601 = vmatmul.mubr.msk.bf16.vlgmr.msra.gmra.mxu1 %vm58_vm0, %v169_v9  ;;  %608 = vmatprep.mubr.msk.bf16.mxu0 %vm666_vm1, %v665_v0 }
   0xd   :  { %616 = vmatprep.mubr.msk.bf16.mxu1 %vm666_vm1, %v665_v0  ;;  %239 = vrot.lane.b32.xlu1 %v237_v10, %s667_s26 }
   0xe   :  { %605 = vmatpush3.bf16.msra.mxu0 %v629_v47  ;;  %613 = vmatpush3.bf16.msra.mxu1 %v630_v48 }
   0xf   :  { %606 = vmatprep.subr.bf16.mxu0 %v665_v0  ;;  %614 = vmatprep.subr.bf16.mxu1 %v665_v0 }
  0x12   :  { %607 = vmatpush3.bf16.msra.mxu0 %v631_v49  ;;  %615 = vmatpush3.bf16.msra.mxu1 %v632_v50 }
  0x7b   :  { %v137_v37 = vpop.permute.xlu1 %136 }
  0x7f   :  { %v240_v39 = vpop.permute.xlu1 %239 }
  0xcb   :  { %v120_v13 = vpop.f32.mrf.mxu0 }
  0xcc   :  { %v223_v14 = vpop.f32.mrf.mxu1  ;;  %v126_v15 = vadd.f32 %v120_v13, %v63_v11 }
  0xcd   :  { %v229_v16 = vadd.f32 %v560_v12, %v223_v14  ;;  %v594_v17 = vpop.f32.mrf.mxu0 }
  0xce   :  { %v602_v18 = vpop.f32.mrf.mxu1  ;;  %633 = vtanh.f32 %v126_v15  ;;  %v559_v25 = vmul.f32 -1.442695, %v126_v15 }
  0xcf   :  { %v123_v19 = vpop.f32.mrf.mxu0  ;;  %635 = vtanh.f32 %v229_v16  ;;  %v564_v26 = vmul.f32 -1.442695, %v229_v16 }
  0xd0   :  { %v226_v20 = vpop.f32.mrf.mxu1  ;;  %637 = vpow2.f32 %v559_v25 }
  0xd1   :  { %v595_v21 = vpop.f32.mrf.mxu0  ;;  %639 = vpow2.f32 %v564_v26 }
  0xd2   :  { %v603_v22 = vpop.f32.mrf.mxu1 }
  0xdb   :  { %v634_v23 = vpop.eup %633 }
  0xdc   :  { %141 = vrot.lane.b32.xlu0 %v634_v23, %s668_s6  ;;  %v636_v24 = vpop.eup %635 }
  0xdd   :  { %v638_v27 = vpop.eup %637 }
  0xde   :  { %v130_v28 = vadd.f32 1.0, %v638_v27  ;;  %v640_v29 = vpop.eup %639 }
  0xdf   :  { %v233_v30 = vadd.f32 1.0, %v640_v29 }
  0xe0   :  { %244 = vrot.lane.b32.xlu0 %v636_v24, %s668_s6  ;;  %641 = vrcp.f32 %v130_v28 }
  0xe1   :  { %643 = vrcp.f32 %v233_v30 }
  0xed   :  { %v642_v31 = vpop.eup %641 }
  0xee   :  { %v644_v34 = vpop.eup %643  ;;  %v139_v38 = vmul.f32 %v642_v31, %v137_v37 }
  0xef   :  { %v242_v42 = vmul.f32 %v644_v34, %v240_v39 }
 0x14e   :  { %v142_v32 = vpop.permute.xlu0 %141 }
 0x14f   :  { %v144_v33 = vmul.f32 %v642_v31, %v142_v32 }
 0x151   :  { %146 = vrot.lane.b32.xlu0 %v144_v33, %s667_s26 }
 0x152   :  { %v245_v35 = vpop.permute.xlu0 %244 }
 0x153   :  { %v247_v36 = vmul.f32 %v644_v34, %v245_v35 }
 0x155   :  { %249 = vrot.lane.b32.xlu1 %v247_v36, %s667_s26 }
 0x1c3   :  { %v147_v40 = vpop.permute.xlu0 %146 }
 0x1c4   :  { %v149_v41 = vadd.f32 %v147_v40, %v139_v38 }
 0x1c6   :  { %645 = vtanh.f32 %v149_v41 }
 0x1c7   :  { %v250_v43 = vpop.permute.xlu1 %249 }
 0x1c8   :  { %v252_v44 = vadd.f32 %v250_v43, %v242_v42 }
 0x1ca   :  { %647 = vtanh.f32 %v252_v44 }
 0x1d3   :  { %v646_v45 = vpop.eup %645 }
 0x1d4   :  { %152 = vrot.lane.b32.xlu0 %v646_v45, %s668_s6 }
 0x1d7   :  { %v648_v46 = vpop.eup %647 }
 0x1d8   :  { %255 = vrot.lane.b32.xlu1 %v648_v46, %s668_s6 }
 0x246   :  { %v153_v51 = vpop.permute.xlu0 %152 }
 0x247   :  { %v764_v52 = vmul.f32 %v642_v31, %v153_v51 }
 0x249   :  { %162 = vrot.lane.b32.xlu0 %v764_v52, %s667_s26  ;;  %v270_v27 = vsel %vm269_vm2, %v764_v52, -inf }
 0x24a   :  { %v256_v53 = vpop.permute.xlu1 %255  ;;  %v271_v29 = vrot.slane %v270_v27, 4 }
 0x24b   :  { %v768_v54 = vmul.f32 %v644_v34, %v256_v53 }
 0x24c   :  { %v272_v35 = vmax.f32 %v270_v27, %v271_v29 }
 0x24d   :  { %265 = vrot.lane.b32.xlu1 %v768_v54, %s667_s26  ;;  %157 = vrot.lane.b32.xlu0 %v149_v41, %s669_s2  ;;  %v283_v31 = vsel %vm269_vm2, %v768_v54, -inf }
 0x24e   :  { %v284_v36 = vrot.slane %v283_v31, 4  ;;  %v273_v40 = vrot.slane %v272_v35, 2 }
 0x250   :  { %v285_v41 = vmax.f32 %v283_v31, %v284_v36  ;;  %v274_v42 = vmax.f32 %v272_v35, %v273_v40 }
 0x251   :  { %260 = vrot.lane.b32.xlu1 %v252_v44, %s669_s2 }
 0x252   :  { %v286_v43 = vrot.slane %v285_v41, 2  ;;  %v275_v45 = vrot.slane %v274_v42, 1 }
 0x254   :  { %v287_v44 = vmax.f32 %v285_v41, %v286_v43  ;;  %v276_v47 = vmax.f32 %v274_v42, %v275_v45 }
 0x256   :  { %v288_v48 = vrot.slane %v287_v44, 1 }
 0x258   :  { %v289_v50 = vmax.f32 %v287_v44, %v288_v48 }
 0x2bb   :  { %v163_v55 = vpop.permute.xlu0 %162 }
 0x2bc   :  { %165 = vst.msk [vmem:[#allocation2] sm:$0xff] %vm58_vm0, %v163_v55 }
 0x2bf   :  { %v266_v56 = vpop.permute.xlu1 %265  ;;  %v158_v57 = vpop.permute.xlu0 %157 }
 0x2c0   :  { %268 = vst.msk [vmem:[#allocation4] sm:$0xff] %vm58_vm0, %v266_v56  ;;  %160 = vst.msk [vmem:[#allocation3] sm:$0xff] %vm58_vm0, %v158_v57 }
 0x2c3   :  { %v261_v58 = vpop.permute.xlu1 %260  ;;  %v298_v59 = vld [vmem:[#allocation2] sm:$0xff] }
 0x2c4   :  { %263 = vst.msk [vmem:[#allocation5] sm:$0xff] %vm58_vm0, %v261_v58  ;;  %v299_v60 = vpack.c.bf16 %v298_v59, %v298_v59 }
 0x2c6   :  { %609 = vmatmul.mubr.msk.bf16.vlgmr.msra.gmra.mxu0 %vm58_vm0, %v299_v60 }
 0x2c7   :  { %v400_v61 = vld [vmem:[#allocation4] sm:$0xff]  ;;  %v367_v13 = vld [vmem:[#allocation3] sm:$0xff] }
 0x2c8   :  { %v401_v62 = vpack.c.bf16 %v400_v61, %v400_v61 }
 0x2ca   :  { %617 = vmatmul.mubr.msk.bf16.vlgmr.msra.gmra.mxu1 %vm58_vm0, %v401_v62 }
 0x2cb   :  { %v469_v14 = vld [vmem:[#allocation5] sm:$0xff] }
 0x386   :  { %v353_v0 = vpop.f32.mrf.mxu0 }
 0x387   :  { %v359_v1 = vadd.f32 %v566_v63, %v353_v0 }
 0x388   :  { %v610_v2 = vpop.f32.mrf.mxu0 }
 0x389   :  { %649 = vtanh.f32 %v359_v1  ;;  %v570_v15 = vmul.f32 -1.442695, %v359_v1 }
 0x38a   :  { %v356_v4 = vpop.f32.mrf.mxu0  ;;  %v455_v5 = vpop.f32.mrf.mxu1 }
 0x38b   :  { %v461_v6 = vadd.f32 %v455_v5, %v399_v3 }
 0x38c   :  { %v611_v7 = vpop.f32.mrf.mxu0  ;;  %v618_v8 = vpop.f32.mrf.mxu1 }
 0x38d   :  { %651 = vtanh.f32 %v461_v6  ;;  %v574_v16 = vmul.f32 -1.442695, %v461_v6 }
 0x38e   :  { %v458_v9 = vpop.f32.mrf.mxu1  ;;  %653 = vpow2.f32 %v570_v15 }
 0x38f   :  { %655 = vpow2.f32 %v574_v16 }
 0x390   :  { %v619_v10 = vpop.f32.mrf.mxu1 }
 0x396   :  { %v650_v11 = vpop.eup %649 }
 0x397   :  { %374 = vrot.lane.b32.xlu0 %v650_v11, %s668_s6 }
 0x39a   :  { %v652_v12 = vpop.eup %651 }
 0x39b   :  { %476 = vrot.lane.b32.xlu1 %v652_v12, %s668_s6  ;;  %369 = vrot.lane.b32.xlu0 %v367_v13, %s667_s26  ;;  %v654_v17 = vpop.eup %653 }
 0x39c   :  { %v363_v18 = vadd.f32 1.0, %v654_v17  ;;  %v656_v19 = vpop.eup %655 }
 0x39d   :  { %v465_v20 = vadd.f32 1.0, %v656_v19 }
 0x39e   :  { %657 = vrcp.f32 %v363_v18 }
 0x39f   :  { %471 = vrot.lane.b32.xlu1 %v469_v14, %s667_s26  ;;  %659 = vrcp.f32 %v465_v20 }
 0x3ab   :  { %v658_v21 = vpop.eup %657 }
 0x3ac   :  { %v660_v24 = vpop.eup %659 }
 0x409   :  { %v375_v22 = vpop.permute.xlu0 %374 }
 0x40a   :  { %v377_v23 = vmul.f32 %v658_v21, %v375_v22 }
 0x40c   :  { %379 = vrot.lane.b32.xlu0 %v377_v23, %s667_s26 }
 0x40d   :  { %v477_v25 = vpop.permute.xlu1 %476  ;;  %v370_v28 = vpop.permute.xlu0 %369 }
 0x40e   :  { %v479_v26 = vmul.f32 %v660_v24, %v477_v25  ;;  %v372_v30 = vmul.f32 %v658_v21, %v370_v28 }
 0x410   :  { %481 = vrot.lane.b32.xlu1 %v479_v26, %s667_s26 }
 0x411   :  { %v472_v32 = vpop.permute.xlu1 %471 }
 0x412   :  { %v474_v37 = vmul.f32 %v660_v24, %v472_v32 }
 0x47e   :  { %v380_v33 = vpop.permute.xlu0 %379 }
 0x47f   :  { %v382_v34 = vadd.f32 %v380_v33, %v372_v30 }
 0x481   :  { %661 = vtanh.f32 %v382_v34 }
 0x482   :  { %v482_v38 = vpop.permute.xlu1 %481 }
 0x483   :  { %v484_v39 = vadd.f32 %v482_v38, %v474_v37 }
 0x485   :  { %663 = vtanh.f32 %v484_v39 }
 0x48e   :  { %v662_v46 = vpop.eup %661 }
 0x48f   :  { %385 = vrot.lane.b32.xlu0 %v662_v46, %s668_s6 }
 0x492   :  { %v664_v49 = vpop.eup %663 }
 0x493   :  { %487 = vrot.lane.b32.xlu1 %v664_v49, %s668_s6  ;;  %278 = vrot.lane.b32.xlu0 %v276_v47, %s667_s26 }
 0x497   :  { %291 = vrot.lane.b32.xlu1 %v289_v50, %s667_s26  ;;  %390 = vrot.lane.b32.xlu0 %v382_v34, %s669_s2 }
 0x49b   :  { %492 = vrot.lane.b32.xlu0 %v484_v39, %s669_s2 }
 0x501   :  { %v386_v51 = vpop.permute.xlu0 %385 }
 0x502   :  { %v388_v52 = vmul.f32 %v658_v21, %v386_v51 }
 0x504   :  { %v501_v53 = vsel %vm269_vm2, %v388_v52, -inf  ;;  %395 = vrot.lane.b32.xlu1 %v388_v52, %s667_s26 }
 0x505   :  { %v502_v54 = vrot.slane %v501_v53, 4  ;;  %v488_v55 = vpop.permute.xlu1 %487  ;;  %v279_v56 = vpop.permute.xlu0 %278 }
 0x506   :  { %v490_v57 = vmul.f32 %v660_v24, %v488_v55  ;;  %282 = vst.msk [vmem:[%s832_s4] sm:$0x1] %vm281_vm3, %v279_v56 }
 0x507   :  { %v503_v58 = vmax.f32 %v501_v53, %v502_v54 }
 0x508   :  { %v514_v59 = vsel %vm269_vm2, %v490_v57, -inf  ;;  %497 = vrot.lane.b32.xlu1 %v490_v57, %s667_s26 }
 0x509   :  { %v504_v60 = vrot.slane %v503_v58, 2  ;;  %v515_v61 = vrot.slane %v514_v59, 4  ;;  %v292_v62 = vpop.permute.xlu1 %291  ;;  %v391_v63 = vpop.permute.xlu0 %390 }
 0x50a   :  { %565 = vst.msk [vmem:[%s833_s5 + $0x1] sm:$0x1] %vm281_vm3, %v292_v62 }
 0x50b   :  { %393 = vst.msk [vmem:[#allocation3] sm:$0xff] %vm58_vm0, %v391_v63  ;;  %v505_v0 = vmax.f32 %v503_v58, %v504_v60  ;;  %v516_v1 = vmax.f32 %v514_v59, %v515_v61 }
 0x50d   :  { %v517_v2 = vrot.slane %v516_v1, 2  ;;  %v493_v3 = vpop.permute.xlu0 %492  ;;  %v506_v4 = vrot.slane %v505_v0, 1 }
 0x50e   :  { %495 = vst.msk [vmem:[#allocation5] sm:$0xff] %vm58_vm0, %v493_v3 }
 0x50f   :  { %v518_v5 = vmax.f32 %v516_v1, %v517_v2  ;;  %v507_v6 = vmax.f32 %v505_v0, %v506_v4 }
 0x511   :  { %509 = vrot.lane.b32.xlu0 %v507_v6, %s667_s26  ;;  %v519_v7 = vrot.slane %v518_v5, 1 }
 0x513   :  { %v520_v8 = vmax.f32 %v518_v5, %v519_v7 }
 0x515   :  { %522 = vrot.lane.b32.xlu1 %v520_v8, %s667_s26 }
 0x576   :  { %v396_v9 = vpop.permute.xlu1 %395 }
 0x577   :  { %398 = vst.msk [vmem:[#allocation2] sm:$0xff] %vm58_vm0, %v396_v9 }
 0x57a   :  { %v498_v10 = vpop.permute.xlu1 %497 }
 0x57b   :  { %500 = vst.msk [vmem:[#allocation4] sm:$0xff] %vm58_vm0, %v498_v10 }
 0x583   :  { %v510_v11 = vpop.permute.xlu0 %509 }
 0x584   :  { %575 = vst.msk [vmem:[%s832_s4 + $0x1] sm:$0x1] %vm281_vm3, %v510_v11 }
 0x587   :  { %v523_v12 = vpop.permute.xlu1 %522 }
 0x588   :  { %525 = vst.msk [vmem:[%s833_s5] sm:$0x1] %vm281_vm3, %v523_v12 }

// kernel: rnn_forward.3
= control target key start
LH: loop header
LB: loop body
LE: loop exit
PB: predicated region body
PF: predicated region fallthrough
CT: control target
= control target key end

     0   :  { %vm60_vm0 = vcmask 261120   ;;  %v664_v0 = vmov 0.0   ;;  %vm665_vm1 = vmmov 0   ;;  %s666_s26 = smov 32   ;;  %s667_s6 = smov 64   ;;  %vm278_vm2 = vcmask 257024   ;;  %s825_s2 = inlined_call_operand.vmem [shape: bf16[32,128], index: 2, kind: input, shape index: {}]   ;;  %s826_s3 = inlined_call_operand.vmem [shape: bf16[32,128], index: 3, kind: input, shape index: {}]   ;;  %s827_s0 = inlined_call_operand.vmem [shape: f32[2,8,128], index: 0, kind: input, shape index: {}]   ;;  %s828_s1 = inlined_call_operand.vmem [shape: f32[2,8,128], index: 1, kind: input, shape index: {}]   ;;  %s829_s4 = inlined_call_operand.vmem [shape: bf16[2,8,32], index: 4, kind: output, shape index: {0}]   ;;  %s830_s5 = inlined_call_operand.vmem [shape: bf16[2,8,32], index: 5, kind: output, shape index: {1}]  }
   0x1   :  { %587 = vmatprep.subr.bf16.mxu0 %v664_v0  ;;  %595 = vmatprep.subr.bf16.mxu1 %v664_v0  ;;  %v624_v1 = vld [vmem:[%s825_s2 + $0x8] sm:$0xff]   ;;  %61 = vst.msk [vmem:[#allocation2] sm:$0xff] %vm60_vm0, %v664_v0  ;;  %62 = vst.msk [vmem:[#allocation3] sm:$0xff] %vm60_vm0, %v664_v0  ;;  %v626_v3 = vld [vmem:[%s825_s2] sm:$0xff]  }
   0x2   :  { %63 = vst.msk [vmem:[#allocation4] sm:$0xff] %vm60_vm0, %v664_v0  ;;  %64 = vst.msk [vmem:[#allocation5] sm:$0xff] %vm60_vm0, %v664_v0  ;;  %v625_v2 = vld [vmem:[%s826_s3 + $0x8] sm:$0xff]   ;;  %591 = vmatprep.mubr.msk.bf16.mxu0 %vm665_vm1, %v664_v0  ;;  %599 = vmatprep.mubr.msk.bf16.mxu1 %vm665_vm1, %v664_v0  ;;  %v627_v4 = vld [vmem:[%s826_s3] sm:$0xff]  }
   0x3   :  { %588 = vmatpush3.bf16.msra.mxu0 %v624_v1  ;;  %596 = vmatpush3.bf16.msra.mxu1 %v625_v2  ;;  %v65_v11 = vld [vmem:[%s827_s0] sm:$0xff]  ;;  %v551_v12 = vld [vmem:[%s828_s1 + $0x8] sm:$0xff] }
   0x4   :  { %589 = vmatprep.subr.bf16.mxu0 %v664_v0  ;;  %597 = vmatprep.subr.bf16.mxu1 %v664_v0  ;;  %v628_v47 = vld [vmem:[%s825_s2 + $0x8] sm:$0xff]   ;;  %v629_v48 = vld [vmem:[%s825_s2] sm:$0xff]   ;;  %s668_s2 = smov 96  }
   0x5   :  { %v630_v49 = vld [vmem:[%s826_s3 + $0x8] sm:$0xff]   ;;  %v631_v50 = vld [vmem:[%s826_s3] sm:$0xff]  }
   0x6   :  { %v559_v63 = vld [vmem:[%s827_s0 + $0x8] sm:$0xff] }
   0x7   :  { %590 = vmatpush3.bf16.msra.mxu0 %v626_v3  ;;  %598 = vmatpush3.bf16.msra.mxu1 %v627_v4  ;;  %v392_v3 = vld [vmem:[%s828_s1] sm:$0xff] }
   0x8   :  { %v66_v5 = vld [vmem:[#allocation2] sm:$0xff]  ;;  %v136_v7 = vld [vmem:[#allocation3] sm:$0xff]  ;;  %603 = vmatprep.subr.bf16.mxu0 %v664_v0  ;;  %611 = vmatprep.subr.bf16.mxu1 %v664_v0 }
   0x9   :  { %v170_v6 = vld [vmem:[#allocation4] sm:$0xff]  ;;  %v67_v8 = vpack.c.bf16 %v66_v5, %v66_v5  ;;  %138 = vrot.lane.b32.xlu1 %v136_v7, %s666_s26  ;;  %v239_v10 = vld [vmem:[#allocation5] sm:$0xff] }
   0xa   :  { %v171_v9 = vpack.c.bf16 %v170_v6, %v170_v6 }
   0xb   :  { %592 = vmatmul.mubr.msk.bf16.vlgmr.msra.gmra.mxu0 %vm60_vm0, %v67_v8 }
   0xc   :  { %600 = vmatmul.mubr.msk.bf16.vlgmr.msra.gmra.mxu1 %vm60_vm0, %v171_v9  ;;  %607 = vmatprep.mubr.msk.bf16.mxu0 %vm665_vm1, %v664_v0 }
   0xd   :  { %615 = vmatprep.mubr.msk.bf16.mxu1 %vm665_vm1, %v664_v0  ;;  %241 = vrot.lane.b32.xlu1 %v239_v10, %s666_s26 }
   0xe   :  { %604 = vmatpush3.bf16.msra.mxu0 %v628_v47  ;;  %612 = vmatpush3.bf16.msra.mxu1 %v630_v49 }
   0xf   :  { %605 = vmatprep.subr.bf16.mxu0 %v664_v0  ;;  %613 = vmatprep.subr.bf16.mxu1 %v664_v0 }
  0x12   :  { %606 = vmatpush3.bf16.msra.mxu0 %v629_v48  ;;  %614 = vmatpush3.bf16.msra.mxu1 %v631_v50 }
  0x7b   :  { %v139_v37 = vpop.permute.xlu1 %138 }
  0x7f   :  { %v242_v39 = vpop.permute.xlu1 %241 }
  0xcb   :  { %v122_v13 = vpop.f32.mrf.mxu0 }
  0xcc   :  { %v225_v14 = vpop.f32.mrf.mxu1  ;;  %v128_v15 = vadd.f32 %v122_v13, %v65_v11 }
  0xcd   :  { %v231_v16 = vadd.f32 %v551_v12, %v225_v14  ;;  %v593_v17 = vpop.f32.mrf.mxu0 }
  0xce   :  { %v601_v18 = vpop.f32.mrf.mxu1  ;;  %632 = vtanh.f32 %v128_v15  ;;  %v550_v25 = vmul.f32 -1.442695, %v128_v15 }
  0xcf   :  { %v125_v19 = vpop.f32.mrf.mxu0  ;;  %634 = vtanh.f32 %v231_v16  ;;  %v555_v26 = vmul.f32 -1.442695, %v231_v16 }
  0xd0   :  { %v228_v20 = vpop.f32.mrf.mxu1  ;;  %636 = vpow2.f32 %v550_v25 }
  0xd1   :  { %v594_v21 = vpop.f32.mrf.mxu0  ;;  %638 = vpow2.f32 %v555_v26 }
  0xd2   :  { %v602_v22 = vpop.f32.mrf.mxu1 }
  0xdb   :  { %v633_v23 = vpop.eup %632 }
  0xdc   :  { %143 = vrot.lane.b32.xlu0 %v633_v23, %s667_s6  ;;  %v635_v24 = vpop.eup %634 }
  0xdd   :  { %v637_v27 = vpop.eup %636 }
  0xde   :  { %v132_v28 = vadd.f32 1.0, %v637_v27  ;;  %v639_v29 = vpop.eup %638 }
  0xdf   :  { %v235_v30 = vadd.f32 1.0, %v639_v29 }
  0xe0   :  { %246 = vrot.lane.b32.xlu0 %v635_v24, %s667_s6  ;;  %640 = vrcp.f32 %v132_v28 }
  0xe1   :  { %642 = vrcp.f32 %v235_v30 }
  0xed   :  { %v641_v31 = vpop.eup %640 }
  0xee   :  { %v643_v34 = vpop.eup %642  ;;  %v141_v38 = vmul.f32 %v641_v31, %v139_v37 }
  0xef   :  { %v244_v42 = vmul.f32 %v643_v34, %v242_v39 }
 0x14e   :  { %v144_v32 = vpop.permute.xlu0 %143 }
 0x14f   :  { %v146_v33 = vmul.f32 %v641_v31, %v144_v32 }
 0x151   :  { %148 = vrot.lane.b32.xlu0 %v146_v33, %s666_s26 }
 0x152   :  { %v247_v35 = vpop.permute.xlu0 %246 }
 0x153   :  { %v249_v36 = vmul.f32 %v643_v34, %v247_v35 }
 0x155   :  { %251 = vrot.lane.b32.xlu1 %v249_v36, %s666_s26 }
 0x1c3   :  { %v149_v40 = vpop.permute.xlu0 %148 }
 0x1c4   :  { %v151_v41 = vadd.f32 %v149_v40, %v141_v38 }
 0x1c6   :  { %644 = vtanh.f32 %v151_v41 }
 0x1c7   :  { %v252_v43 = vpop.permute.xlu1 %251 }
 0x1c8   :  { %v254_v44 = vadd.f32 %v252_v43, %v244_v42 }
 0x1ca   :  { %646 = vtanh.f32 %v254_v44 }
 0x1d3   :  { %v645_v45 = vpop.eup %644 }
 0x1d4   :  { %154 = vrot.lane.b32.xlu0 %v645_v45, %s667_s6 }
 0x1d7   :  { %v647_v46 = vpop.eup %646 }
 0x1d8   :  { %257 = vrot.lane.b32.xlu1 %v647_v46, %s667_s6 }
 0x246   :  { %v155_v51 = vpop.permute.xlu0 %154 }
 0x247   :  { %v763_v52 = vmul.f32 %v641_v31, %v155_v51 }
 0x249   :  { %164 = vrot.lane.b32.xlu0 %v763_v52, %s666_s26  ;;  %v571_v36 = vpack.c.bf16 %v763_v52, %v763_v52 }
 0x24a   :  { %v258_v53 = vpop.permute.xlu1 %257 }
 0x24b   :  { %v767_v54 = vmul.f32 %v643_v34, %v258_v53 }
 0x24d   :  { %267 = vrot.lane.b32.xlu1 %v767_v54, %s666_s26  ;;  %159 = vrot.lane.b32.xlu0 %v151_v41, %s668_s2  ;;  %v572_v38 = vpack.c.bf16 %v767_v54, %v767_v54 }
 0x251   :  { %262 = vrot.lane.b32.xlu1 %v254_v44, %s668_s2 }
 0x2bb   :  { %v165_v55 = vpop.permute.xlu0 %164 }
 0x2bc   :  { %167 = vst.msk [vmem:[#allocation2] sm:$0xff] %vm60_vm0, %v165_v55 }
 0x2bf   :  { %v268_v56 = vpop.permute.xlu1 %267  ;;  %v160_v57 = vpop.permute.xlu0 %159 }
 0x2c0   :  { %270 = vst.msk [vmem:[#allocation4] sm:$0xff] %vm60_vm0, %v268_v56  ;;  %162 = vst.msk [vmem:[#allocation3] sm:$0xff] %vm60_vm0, %v160_v57 }
 0x2c3   :  { %v263_v58 = vpop.permute.xlu1 %262  ;;  %v291_v59 = vld [vmem:[#allocation2] sm:$0xff] }
 0x2c4   :  { %265 = vst.msk [vmem:[#allocation5] sm:$0xff] %vm60_vm0, %v263_v58  ;;  %v292_v60 = vpack.c.bf16 %v291_v59, %v291_v59 }
 0x2c6   :  { %608 = vmatmul.mubr.msk.bf16.vlgmr.msra.gmra.mxu0 %vm60_vm0, %v292_v60 }
 0x2c7   :  { %v393_v61 = vld [vmem:[#allocation4] sm:$0xff]  ;;  %v360_v13 = vld [vmem:[#allocation3] sm:$0xff] }
 0x2c8   :  { %v394_v62 = vpack.c.bf16 %v393_v61, %v393_v61 }
 0x2ca   :  { %616 = vmatmul.mubr.msk.bf16.vlgmr.msra.gmra.mxu1 %vm60_vm0, %v394_v62 }
 0x2cb   :  { %v462_v14 = vld [vmem:[#allocation5] sm:$0xff] }
 0x386   :  { %v346_v0 = vpop.f32.mrf.mxu0 }
 0x387   :  { %v352_v1 = vadd.f32 %v559_v63, %v346_v0 }
 0x388   :  { %v609_v2 = vpop.f32.mrf.mxu0 }
 0x389   :  { %648 = vtanh.f32 %v352_v1  ;;  %v563_v15 = vmul.f32 -1.442695, %v352_v1 }
 0x38a   :  { %v349_v4 = vpop.f32.mrf.mxu0  ;;  %v448_v5 = vpop.f32.mrf.mxu1 }
 0x38b   :  { %v454_v6 = vadd.f32 %v448_v5, %v392_v3 }
 0x38c   :  { %v610_v7 = vpop.f32.mrf.mxu0  ;;  %v617_v8 = vpop.f32.mrf.mxu1 }
 0x38d   :  { %650 = vtanh.f32 %v454_v6  ;;  %v567_v16 = vmul.f32 -1.442695, %v454_v6 }
 0x38e   :  { %v451_v9 = vpop.f32.mrf.mxu1  ;;  %652 = vpow2.f32 %v563_v15 }
 0x38f   :  { %654 = vpow2.f32 %v567_v16 }
 0x390   :  { %v618_v10 = vpop.f32.mrf.mxu1 }
 0x396   :  { %v649_v11 = vpop.eup %648 }
 0x397   :  { %367 = vrot.lane.b32.xlu0 %v649_v11, %s667_s6 }
 0x39a   :  { %v651_v12 = vpop.eup %650 }
 0x39b   :  { %469 = vrot.lane.b32.xlu1 %v651_v12, %s667_s6  ;;  %362 = vrot.lane.b32.xlu0 %v360_v13, %s666_s26  ;;  %v653_v17 = vpop.eup %652 }
 0x39c   :  { %v356_v18 = vadd.f32 1.0, %v653_v17  ;;  %v655_v19 = vpop.eup %654 }
 0x39d   :  { %v458_v20 = vadd.f32 1.0, %v655_v19 }
 0x39e   :  { %656 = vrcp.f32 %v356_v18 }
 0x39f   :  { %464 = vrot.lane.b32.xlu1 %v462_v14, %s666_s26  ;;  %658 = vrcp.f32 %v458_v20 }
 0x3ab   :  { %v657_v21 = vpop.eup %656 }
 0x3ac   :  { %v659_v24 = vpop.eup %658 }
 0x409   :  { %v368_v22 = vpop.permute.xlu0 %367 }
 0x40a   :  { %v370_v23 = vmul.f32 %v657_v21, %v368_v22 }
 0x40c   :  { %372 = vrot.lane.b32.xlu0 %v370_v23, %s666_s26 }
 0x40d   :  { %v470_v25 = vpop.permute.xlu1 %469  ;;  %v363_v27 = vpop.permute.xlu0 %362 }
 0x40e   :  { %v472_v26 = vmul.f32 %v659_v24, %v470_v25  ;;  %v365_v28 = vmul.f32 %v657_v21, %v363_v27 }
 0x410   :  { %474 = vrot.lane.b32.xlu1 %v472_v26, %s666_s26 }
 0x411   :  { %v465_v29 = vpop.permute.xlu1 %464 }
 0x412   :  { %v467_v32 = vmul.f32 %v659_v24, %v465_v29 }
 0x47e   :  { %v373_v30 = vpop.permute.xlu0 %372 }
 0x47f   :  { %v375_v31 = vadd.f32 %v373_v30, %v365_v28 }
 0x481   :  { %660 = vtanh.f32 %v375_v31 }
 0x482   :  { %v475_v33 = vpop.permute.xlu1 %474 }
 0x483   :  { %v477_v34 = vadd.f32 %v475_v33, %v467_v32 }
 0x485   :  { %662 = vtanh.f32 %v477_v34 }
 0x48e   :  { %v661_v35 = vpop.eup %660 }
 0x48f   :  { %378 = vrot.lane.b32.xlu0 %v661_v35, %s667_s6 }
 0x492   :  { %v663_v37 = vpop.eup %662 }
 0x493   :  { %480 = vrot.lane.b32.xlu1 %v663_v37, %s667_s6  ;;  %275 = vrot.lane.b32.xlu0 %v571_v36, %s666_s26 }
 0x497   :  { %284 = vrot.lane.b32.xlu1 %v572_v38, %s666_s26  ;;  %383 = vrot.lane.b32.xlu0 %v375_v31, %s668_s2 }
 0x49b   :  { %485 = vrot.lane.b32.xlu0 %v477_v34, %s668_s2 }
 0x501   :  { %v379_v39 = vpop.permute.xlu0 %378 }
 0x502   :  { %v381_v40 = vmul.f32 %v657_v21, %v379_v39 }
 0x504   :  { %v573_v41 = vpack.c.bf16 %v381_v40, %v381_v40  ;;  %388 = vrot.lane.b32.xlu1 %v381_v40, %s666_s26 }
 0x505   :  { %v481_v42 = vpop.permute.xlu1 %480  ;;  %v276_v43 = vpop.permute.xlu0 %275 }
 0x506   :  { %v483_v44 = vmul.f32 %v659_v24, %v481_v42  ;;  %279 = vst.msk [vmem:[%s829_s4] sm:$0xf] %vm278_vm2, %v276_v43  ;;  %498 = vrot.lane.b32.xlu0 %v573_v41, %s666_s26 }
 0x508   :  { %490 = vrot.lane.b32.xlu1 %v483_v44, %s666_s26  ;;  %v574_v47 = vpack.c.bf16 %v483_v44, %v483_v44 }
 0x509   :  { %v285_v45 = vpop.permute.xlu1 %284  ;;  %v384_v46 = vpop.permute.xlu0 %383 }
 0x50a   :  { %558 = vst.msk [vmem:[%s830_s5 + $0x4] sm:$0xf] %vm278_vm2, %v285_v45 }
 0x50b   :  { %386 = vst.msk [vmem:[#allocation3] sm:$0xff] %vm60_vm0, %v384_v46 }
 0x50c   :  { %507 = vrot.lane.b32.xlu1 %v574_v47, %s666_s26 }
 0x50d   :  { %v486_v48 = vpop.permute.xlu0 %485 }
 0x50e   :  { %488 = vst.msk [vmem:[#allocation5] sm:$0xff] %vm60_vm0, %v486_v48 }
 0x576   :  { %v389_v49 = vpop.permute.xlu1 %388 }
 0x577   :  { %391 = vst.msk [vmem:[#allocation2] sm:$0xff] %vm60_vm0, %v389_v49 }
 0x578   :  { %v499_v50 = vpop.permute.xlu0 %498 }
 0x579   :  { %569 = vst.msk [vmem:[%s829_s4 + $0x4] sm:$0xf] %vm278_vm2, %v499_v50 }
 0x57a   :  { %v491_v51 = vpop.permute.xlu1 %490 }
 0x57b   :  { %493 = vst.msk [vmem:[#allocation4] sm:$0xff] %vm60_vm0, %v491_v51 }
 0x57e   :  { %v508_v52 = vpop.permute.xlu1 %507 }
 0x57f   :  { %510 = vst.msk [vmem:[%s830_s5] sm:$0xf] %vm278_vm2, %v508_v52 }

</bundles_post_ra>
